<compile_context>
chip_gen: v6e
topology: v6e:2x2x1
jax: 0.10.0
libtpu: 0.0.40
codegen_flags: <defaults>
</compile_context>

<pallas_src>
import numpy as np
import jax
import jax.numpy as jnp
from jax.experimental import pallas as pl
from jax.experimental.pallas import tpu as pltpu


_TAPS = [(dy, dx) for dy in (-1, 0, 1) for dx in (-1, 0, 1)]      # ky/kx-major
_NC_TAPS = [t for t in _TAPS if t != (0, 0)]                      # 8 masked taps
_TARGET_LANES = 8192     # lanes per grid step (whole images); >= 512 per review


# ---------------------- pltpu.roll direction probe ---------------------------
_ROLL_MODE = {}   # dtype-name -> "jnp" | "flipped" | "concat"


def _probe_roll_mode(dtype=jnp.bfloat16):
    """Resolve pltpu.roll's rotation direction once per process for `dtype`
    (single- and multi-element shifts must agree).  Falls back to a
    concatenate-based shift only if roll is unavailable/inconsistent.
    Call once OUTSIDE jit; afterwards it is a cached dict lookup."""
    key = jnp.dtype(dtype).name
    if key in _ROLL_MODE:
        return _ROLL_MODE[key]

    def one(shift):
        def k(x_ref, o_ref):
            o_ref[...] = pltpu.roll(x_ref[...], shift, axis=1)
        xp = jnp.arange(256, dtype=jnp.float32).astype(dtype).reshape(1, 256)
        y = pl.pallas_call(
            k, out_shape=jax.ShapeDtypeStruct((1, 256), dtype))(xp)
        return float(jax.block_until_ready(y)[0, 0])

    try:
        a1, a5 = one(1), one(5)
        if a1 == 255.0 and a5 == 251.0:      # matches jnp.roll semantics
            mode = "jnp"
        elif a1 == 1.0 and a5 == 5.0:        # out[i] = in[i + shift]
            mode = "flipped"
        else:
            mode = "concat"
    except Exception:
        mode = "concat"   # TODO(synk): don't ship the slow fallback in prod
    _ROLL_MODE[key] = mode
    return mode


# ----------------------------- Pallas kernel ---------------------------------
def _make_ba_kernel(W, lanes, c_pad, roll_mode):
    """Kernel over one (channels x `lanes`) lane-dense slab holding whole
    images.  Host-precomputed per-pixel boundary masks zero every tap that
    crosses an image edge, so lane-axis roll wrap and cross-image packing are
    both safe without a halo."""

    def shift_lanes(a, off):
        # result[:, i] = a[:, i + off]; wrapped lanes are zeroed by the mask.
        if off == 0:
            return a
        if roll_mode == "concat":            # slow fallback (no XLU roll)
            c = a.shape[0]
            if off > 0:
                return jnp.concatenate(
                    [a[:, off:], jnp.zeros((c, off), a.dtype)], axis=1)
            return jnp.concatenate(
                [jnp.zeros((c, -off), a.dtype), a[:, :off]], axis=1)
        shift = (-off) % lanes if roll_mode == "jnp" else off % lanes
        return pltpu.roll(a, shift, axis=1)

    def kernel(act_ref, mask_ref, w3_ref, wcf_ref, b_ref, o_ref):
        f32 = jnp.float32
        acts = act_ref[...]                  # (2*c_pad, lanes)   bf16
        cdt = acts.dtype                     # matmul-operand dtype
        x = acts[:c_pad]                     # input image channels (padded)
        y = acts[c_pad:]                     # fused pooled-branch features
        masks = mask_ref[...]                # (8, lanes) {0,1}   bf16
        wcf = wcf_ref[...]                   # (c_pad, c_pad)     bf16

        # hoist the 8 per-tap boundary-mask rows once, reused by all 3 convs
        mask_rows = [masks[i:i + 1, :] for i in range(len(_NC_TAPS))]

        def conv3x3(inp, ci, with_bias):
            # 9 accumulated (c_pad,c_pad)@(c_pad,lanes) MXU matmuls, f32 acc;
            # only one shifted tap slab is live at a time (no sublane concat).
            acc = None
            mi = 0
            for t, (dy, dx) in enumerate(_TAPS):
                s = shift_lanes(inp, dy * W + dx)
                if (dy, dx) != (0, 0):
                    s = s * mask_rows[mi]    # zero out-of-image / wrapped taps
                    mi += 1
                part = jnp.dot(w3_ref[ci, t], s, preferred_element_type=f32)
                acc = part if acc is None else acc + part
            if with_bias:
                acc = acc + b_ref[ci]        # (c_pad, 1) f32 bias
            return acc                       # (c_pad, lanes) f32

        # NOTE(perf): if profiling shows VALU-bound, swap sigmoid for
        # pl.reciprocal(1 + jnp.exp(-v), approx=True) (EUP) and re-check tol.
        sigmoid = jax.nn.sigmoid

        # fuse_conv (3x3, no bias) + relu
        hx = jax.nn.relu(conv3x3(y, 0, with_bias=False))
        # conv_final (1x1, bias) + sigmoid
        logits = jnp.dot(wcf, hx.astype(cdt),
                         preferred_element_type=f32) + b_ref[0]
        mask1 = sigmoid(logits)
        out1 = x.astype(f32) * mask1
        # mask_conv_1 (3x3, bias) + relu
        hx2 = jax.nn.relu(conv3x3(out1.astype(cdt), 1, with_bias=True))
        # mask_conv_2 (3x3, bias) + sigmoid
        mask2 = sigmoid(conv3x3(hx2.astype(cdt), 2, with_bias=True))
        o_ref[...] = (out1 * mask2).astype(o_ref.dtype)

    return kernel


# ------------------------------ JAX glue --------------------------------------
def _conv_nchw(x, w, padding):
    return jax.lax.conv_general_dilated(
        x, w, window_strides=(1, 1), padding=padding,
        dimension_numbers=("NCHW", "OIHW", "NCHW"))


def _adaptive_avg_pool(x, out_size, axis):
    # exact PyTorch AdaptiveAvgPool: segment i = [floor(i*L/k), ceil((i+1)*L/k))
    in_size = x.shape[axis]
    pieces = []
    for i in range(out_size):
        start = (i * in_size) // out_size
        end = ((i + 1) * in_size + out_size - 1) // out_size
        seg = jax.lax.slice_in_dim(x, start, end, axis=axis)
        pieces.append(jnp.mean(seg, axis=axis, keepdims=True))
    return jnp.concatenate(pieces, axis=axis)


def _upsample_nearest_axis(x, out_size, axis):
    # PyTorch F.interpolate(mode='nearest'): src = floor(dst * in / out)
    in_size = x.shape[axis]
    idx = (jnp.arange(out_size) * in_size) // out_size
    return jnp.take(x, idx, axis=axis)


def _branch_features(x, p):
    # pooled-strip branches (tiny maps -> plain-JAX glue)
    N, C, H, W = x.shape
    x1h = _conv_nchw(_adaptive_avg_pool(x, 1, axis=3), p["c1h"], ((1, 1), (0, 0)))
    x1h = jnp.broadcast_to(x1h, (N, x1h.shape[1], H, W))
    x1w = _conv_nchw(_adaptive_avg_pool(x, 1, axis=2), p["c1w"], ((0, 0), (1, 1)))
    x1w = jnp.broadcast_to(x1w, (N, x1w.shape[1], H, W))

    def strip(k, wh, ww):
        ah = _conv_nchw(_adaptive_avg_pool(x, k, axis=3), wh, ((1, 1), (1, 1)))
        aw = _conv_nchw(_adaptive_avg_pool(x, k, axis=2), ww, ((1, 1), (1, 1)))
        return (_upsample_nearest_axis(ah, W, axis=3)
                + _upsample_nearest_axis(aw, H, axis=2))

    return jnp.concatenate(
        [x1h + x1w,
         strip(3, p["c3h"], p["c3w"]),
         strip(5, p["c5h"], p["c5w"]),
         strip(7, p["c7h"], p["c7w"])], axis=1)


# --------------------------- packing helpers ----------------------------------
def _round_up(v, m):
    return -(-v // m) * m


def _pack_lanes(a, c_pad, n_pad, dtype):
    """(N, C, H, W) -> channel-major lane-dense (c_pad, n_pad*H*W), zero-padded
    and cast to the activation dtype (cast fuses into the producer under jit)."""
    N, C, H, W = a.shape
    a = jnp.pad(a.astype(dtype),
                ((0, n_pad - N), (0, c_pad - C), (0, 0), (0, 0)))
    return jnp.transpose(a, (1, 0, 2, 3)).reshape(c_pad, n_pad * H * W)


def _build_tap_masks(H, W, images_per_tile, dtype):
    """(8, images_per_tile*H*W) {0,1} masks, one row per non-center tap."""
    HW = H * W
    lane = np.arange(images_per_tile * HW)
    r = (lane % HW) // W
    c = lane % W
    rows = []
    for dy, dx in _NC_TAPS:
        m = np.ones(lane.shape, dtype=bool)
        if dy > 0:
            m &= r < H - dy
        elif dy < 0:
            m &= r >= -dy
        if dx > 0:
            m &= c < W - dx
        elif dx < 0:
            m &= c >= -dx
        rows.append(m)
    return jnp.asarray(np.stack(rows).astype(np.float32), dtype=dtype)


def _pack_conv3(w, c_pad):
    """OIHW (O, I, 3, 3) -> (9, c_pad, c_pad), tap-major in _TAPS order."""
    O, I, kh, kw = w.shape
    wt = jnp.transpose(w, (2, 3, 0, 1)).reshape(kh * kw, O, I)
    return jnp.pad(wt, ((0, 0), (0, c_pad - O), (0, c_pad - I)))


# ------------------------------ wrapper ----------------------------------------
def ba_block_pallas(x, p, *, act_dtype=jnp.bfloat16, out_dtype=None):
    """Pallas forward pass.  act_dtype is the HBM/VMEM + matmul-operand dtype
    of the big activations (accumulation and the element-wise chain stay f32);
    the kernel writes its output in out_dtype (defaults to act_dtype) to halve
    writeback.  Call _probe_roll_mode(act_dtype) once outside jit first."""
    out_dtype = act_dtype if out_dtype is None else out_dtype
    N, c_in, H, W = x.shape
    HW = H * W
    y = _branch_features(x, p)               # (N, 4*mid, H, W) plain-JAX glue
    c4 = y.shape[1]
    mid = c4 // 4
    out_ch = p["cf_w"].shape[0]
    c_pad = _round_up(max(c_in, c4, mid, out_ch), 8)

    # Pack whole images into big lane-dense tiles so per-grid-step overhead,
    # mask reuse and MXU weight pushes amortize (masks make packing safe).
    g = max(1, min(N, _TARGET_LANES // max(HW, 1)))
    if (g * HW) % 128 != 0:
        g = N                                # single full-extent block
    n_pad = _round_up(N, g)
    lanes_tile = g * HW
    lanes_total = n_pad * HW
    n_tiles = n_pad // g

    # One fused activation input (fewer DMA descriptors / BlockSpec windows).
    acts = jnp.concatenate([_pack_lanes(x, c_pad, n_pad, act_dtype),
                            _pack_lanes(y, c_pad, n_pad, act_dtype)], axis=0)
    tap_masks = _build_tap_masks(H, W, g, act_dtype)

    # Packed weights: (3, 9, c_pad, c_pad) bf16 (fuse, mask1, mask2),
    # (c_pad, c_pad) bf16 1x1 weight, (3, c_pad, 1) f32 biases (cf, m1, m2).
    w3 = jnp.stack([_pack_conv3(p["fuse_w"], c_pad),
                    _pack_conv3(p["m1_w"], c_pad),
                    _pack_conv3(p["m2_w"], c_pad)]).astype(act_dtype)
    wcf = jnp.pad(p["cf_w"][:, :, 0, 0],
                  ((0, c_pad - out_ch), (0, c_pad - mid))).astype(act_dtype)
    biases = jnp.stack([jnp.pad(p["cf_b"], (0, c_pad - out_ch)),
                        jnp.pad(p["m1_b"], (0, c_pad - out_ch)),
                        jnp.pad(p["m2_b"], (0, c_pad - out_ch))])
    biases = biases.reshape(3, c_pad, 1).astype(jnp.float32)

    act_bytes = jnp.dtype(act_dtype).itemsize
    cost = pl.CostEstimate(
        flops=int(2 * lanes_total * c_pad * c_pad * (3 * 9 + 1)),
        transcendentals=int(2 * lanes_total * c_pad),
        bytes_accessed=int(2 * c_pad * lanes_total * act_bytes
                           + 8 * lanes_tile * act_bytes * n_tiles
                           + c_pad * lanes_total * jnp.dtype(out_dtype).itemsize
                           + (w3.size + wcf.size) * act_bytes
                           + biases.size * 4))

    kernel = _make_ba_kernel(W, lanes_tile, c_pad, _probe_roll_mode(act_dtype))

    out_pk = pl.pallas_call(
        kernel,
        out_shape=jax.ShapeDtypeStruct((c_pad, lanes_total), out_dtype),
        grid_spec=pltpu.PrefetchScalarGridSpec(
            num_scalar_prefetch=0,
            grid=(n_tiles,),
            in_specs=[
                pl.BlockSpec((2 * c_pad, lanes_tile), lambda t: (0, t)),
                pl.BlockSpec((8, lanes_tile), lambda t: (0, 0)),
                pl.BlockSpec((3, 9, c_pad, c_pad), lambda t: (0, 0, 0, 0)),
                pl.BlockSpec((c_pad, c_pad), lambda t: (0, 0)),
                pl.BlockSpec((3, c_pad, 1), lambda t: (0, 0, 0)),
            ],
            out_specs=pl.BlockSpec((c_pad, lanes_tile), lambda t: (0, t)),
        ),
        compiler_params=pltpu.CompilerParams(
            dimension_semantics=("parallel",),
            vmem_limit_bytes=48 * 1024 * 1024),
        cost_estimate=cost,
    )(acts, tap_masks, w3, wcf, biases)

    out = out_pk[:out_ch, :].reshape(out_ch, n_pad, H, W)
    return jnp.transpose(out, (1, 0, 2, 3))[:N]      # (N, out_ch, H, W)


# ------------------------- plain-JAX reference --------------------------------
def ba_block_ref(x, p, act_dtype=jnp.float32):
    """Reference mirroring the kernel's quantization points (act_dtype conv
    operands, f32 accumulation and element-wise chain), so the comparison
    isolates kernel-structural correctness.  act_dtype=f32 reproduces the
    all-f32 PyTorch module exactly."""
    y = _branch_features(x, p)
    f32 = jnp.float32

    def q(v):
        return v.astype(act_dtype)

    def conv(v, w, pad):
        return jax.lax.conv_general_dilated(
            q(v), q(w), (1, 1), pad,
            dimension_numbers=("NCHW", "OIHW", "NCHW"),
            preferred_element_type=f32)

    hx = jax.nn.relu(conv(y, p["fuse_w"], ((1, 1), (1, 1))))
    m1 = jax.nn.sigmoid(conv(hx, p["cf_w"], ((0, 0), (0, 0)))
                        + p["cf_b"][None, :, None, None])
    out1 = q(x).astype(f32) * m1
    hx2 = jax.nn.relu(conv(out1, p["m1_w"], ((1, 1), (1, 1)))
                      + p["m1_b"][None, :, None, None])
    m2 = jax.nn.sigmoid(conv(hx2, p["m2_w"], ((1, 1), (1, 1)))
                        + p["m2_b"][None, :, None, None])
    return out1 * m2


# --------------------------------- main ----------------------------------------
if __name__ == "__main__":
    N, C_in, H, W = 2, 4, 16, 16
    outplanes = 4          # == inplanes so that `x * mask_1` matches the module
    mid = outplanes // 2

    root = jax.random.PRNGKey(0)
    kx, kp = jax.random.split(root)
    x = jax.random.normal(kx, (N, C_in, H, W), dtype=jnp.float32)

    ks = jax.random.split(kp, 15)

    def init(k, shape, scale=0.3):
        return (scale * jax.random.normal(k, shape)).astype(jnp.float32)

    params = {
        "c1h": init(ks[0], (mid, C_in, 3, 1)),
        "c1w": init(ks[1], (mid, C_in, 1, 3)),
        "c3h": init(ks[2], (mid, C_in, 3, 3)),
        "c3w": init(ks[3], (mid, C_in, 3, 3)),
        "c5h": init(ks[4], (mid, C_in, 3, 3)),
        "c5w": init(ks[5], (mid, C_in, 3, 3)),
        "c7h": init(ks[6], (mid, C_in, 3, 3)),
        "c7w": init(ks[7], (mid, C_in, 3, 3)),
        "fuse_w": init(ks[8], (mid, 4 * mid, 3, 3)),
        "cf_w": init(ks[9], (outplanes, mid, 1, 1)),
        "cf_b": init(ks[10], (outplanes,), scale=0.1),
        "m1_w": init(ks[11], (outplanes, outplanes, 3, 3)),
        "m1_b": init(ks[12], (outplanes,), scale=0.1),
        "m2_w": init(ks[13], (outplanes, outplanes, 3, 3)),
        "m2_b": init(ks[14], (outplanes,), scale=0.1),
    }

    # Resolve pltpu.roll semantics once, OUTSIDE jit (cached per process).
    _probe_roll_mode(jnp.bfloat16)

    # jit the wrapper so the f32->bf16 casts fuse into their producers.
    fwd = jax.jit(ba_block_pallas)
    out = jax.block_until_ready(fwd(x, params))
    assert out.shape == (N, outplanes, H, W)

    # Reference mirrors the kernel's bf16-operand / f32-accumulate policy (a
    # deliberate perf deviation from the all-f32 nn.Module); the tolerance also
    # covers bf16 output rounding and accumulation-order differences.
    ref = jax.block_until_ready(ba_block_ref(x, params, act_dtype=jnp.bfloat16))
    out_f32 = out.astype(jnp.float32)
    if not bool(jnp.allclose(out_f32, ref, atol=5e-3, rtol=1e-2)):
        max_err = float(jnp.max(jnp.abs(out_f32 - ref)))
        raise AssertionError(f"kernel/reference mismatch, max abs err = {max_err}")

    print("KERNEL_OK")
</pallas_src>

<mosaic_0001>
module attributes {stable_mosaic.version = 11 : i64} {
  func.func @k(%arg0: memref<1x256xbf16, #tpu.memory_space<vmem>>, %arg1: memref<1x256xbf16, #tpu.memory_space<vmem>>) attributes {dimension_semantics = [], scalar_prefetch = 0 : i64, scratch_operands = 0 : i64, tpu.core_type = #tpu.core_type<tc>} {
    %c0 = arith.constant 0 : index
    %c0_0 = arith.constant 0 : index
    %0 = vector.load %arg0[%c0, %c0_0] : memref<1x256xbf16, #tpu.memory_space<vmem>>, vector<1x256xbf16>
    %c1_i32 = arith.constant 1 : i32
    %1 = tpu.dynamic_rotate %0 by %c1_i32 dim 1 : vector<1x256xbf16>, i32 -> vector<1x256xbf16>
    %c0_1 = arith.constant 0 : index
    %c0_2 = arith.constant 0 : index
    %2 = vector.load %arg1[%c0_1, %c0_2] : memref<1x256xbf16, #tpu.memory_space<vmem>>, vector<1x256xbf16>
    tpu.vector_store %arg1[%c0_1, %c0_2], %1 {strides = array<i32>} : memref<1x256xbf16, #tpu.memory_space<vmem>>, vector<1x256xbf16>,
    return
  }
}

module attributes {stable_mosaic.version = 11 : i64} {
  func.func @kernel(%arg0: i32, %arg1: memref<16x512xbf16, #tpu.memory_space<vmem>>, %arg2: memref<8x512xbf16, #tpu.memory_space<vmem>>, %arg3: memref<3x9x8x8xbf16, #tpu.memory_space<vmem>>, %arg4: memref<8x8xbf16, #tpu.memory_space<vmem>>, %arg5: memref<3x8x1xf32, #tpu.memory_space<vmem>>, %arg6: memref<8x512xbf16, #tpu.memory_space<vmem>>) attributes {dimension_semantics = [#tpu.dimension_semantics<parallel>], iteration_bounds = array<i64: 1>, scalar_prefetch = 0 : i64, scratch_operands = 0 : i64, tpu.core_type = #tpu.core_type<tc>, window_params = [{transform_indices = @transform_0, window_bounds = array<i64: 16, 512>}, {pipeline_mode = #tpu.pipeline_mode<synchronous>, transform_indices = @transform_1, window_bounds = array<i64: 8, 512>}, {pipeline_mode = #tpu.pipeline_mode<synchronous>, transform_indices = @transform_2, window_bounds = array<i64: 3, 9, 8, 8>}, {pipeline_mode = #tpu.pipeline_mode<synchronous>, transform_indices = @transform_3, window_bounds = array<i64: 8, 8>}, {pipeline_mode = #tpu.pipeline_mode<synchronous>, transform_indices = @transform_4, window_bounds = array<i64: 3, 8, 1>}, {transform_indices = @transform_5, window_bounds = array<i64: 8, 512>}]} {
    %c0 = arith.constant 0 : index
    %c0_0 = arith.constant 0 : index
    %0 = vector.load %arg1[%c0, %c0_0] : memref<16x512xbf16, #tpu.memory_space<vmem>>, vector<16x512xbf16>
    %1 = vector.extract_strided_slice %0 {offsets = [0, 0], sizes = [8, 512], strides = [1, 1]} : vector<16x512xbf16> to vector<8x512xbf16>
    %2 = vector.extract_strided_slice %0 {offsets = [8, 0], sizes = [8, 512], strides = [1, 1]} : vector<16x512xbf16> to vector<8x512xbf16>
    %c0_1 = arith.constant 0 : index
    %c0_2 = arith.constant 0 : index
    %3 = vector.load %arg2[%c0_1, %c0_2] : memref<8x512xbf16, #tpu.memory_space<vmem>>, vector<8x512xbf16>
    %c0_3 = arith.constant 0 : index
    %c0_4 = arith.constant 0 : index
    %4 = vector.load %arg4[%c0_3, %c0_4] : memref<8x8xbf16, #tpu.memory_space<vmem>>, vector<8x8xbf16>
    %5 = vector.extract_strided_slice %3 {offsets = [0, 0], sizes = [1, 512], strides = [1, 1]} : vector<8x512xbf16> to vector<1x512xbf16>
    %6 = vector.extract_strided_slice %3 {offsets = [1, 0], sizes = [1, 512], strides = [1, 1]} : vector<8x512xbf16> to vector<1x512xbf16>
    %7 = vector.extract_strided_slice %3 {offsets = [2, 0], sizes = [1, 512], strides = [1, 1]} : vector<8x512xbf16> to vector<1x512xbf16>
    %8 = vector.extract_strided_slice %3 {offsets = [3, 0], sizes = [1, 512], strides = [1, 1]} : vector<8x512xbf16> to vector<1x512xbf16>
    %9 = vector.extract_strided_slice %3 {offsets = [4, 0], sizes = [1, 512], strides = [1, 1]} : vector<8x512xbf16> to vector<1x512xbf16>
    %10 = vector.extract_strided_slice %3 {offsets = [5, 0], sizes = [1, 512], strides = [1, 1]} : vector<8x512xbf16> to vector<1x512xbf16>
    %11 = vector.extract_strided_slice %3 {offsets = [6, 0], sizes = [1, 512], strides = [1, 1]} : vector<8x512xbf16> to vector<1x512xbf16>
    %12 = vector.extract_strided_slice %3 {offsets = [7, 0], sizes = [1, 512], strides = [1, 1]} : vector<8x512xbf16> to vector<1x512xbf16>
    %cst = arith.constant 0.000000e+00 : bf16
    %13 = vector.broadcast %cst : bf16 to vector<8x17xbf16>
    %14 = vector.extract_strided_slice %2 {offsets = [0, 0], sizes = [8, 495], strides = [1, 1]} : vector<8x512xbf16> to vector<8x495xbf16>
    %15 = tpu.concatenate %13, %14 in 1 : vector<8x17xbf16>, vector<8x495xbf16> -> vector<8x512xbf16>
    %16 = vector.broadcast %5 : vector<1x512xbf16> to vector<8x512xbf16>
    %17 = arith.mulf %15, %16 : vector<8x512xbf16>
    %c0_5 = arith.constant 0 : index
    %c0_6 = arith.constant 0 : index
    %c0_7 = arith.constant 0 : index
    %c0_8 = arith.constant 0 : index
    %18 = vector.load %arg3[%c0_5, %c0_6, %c0_7, %c0_8] : memref<3x9x8x8xbf16, #tpu.memory_space<vmem>>, vector<1x1x8x8xbf16>
    %19 = vector.shape_cast %18 : vector<1x1x8x8xbf16> to vector<8x8xbf16>
    %cst_9 = arith.constant dense<0.000000e+00> : vector<8x512xf32>
    %20 = tpu.matmul %19, %17, %cst_9 {dimension_numbers = #tpu.dot_dimension_numbers<[1], [0], [0], [1], [0, 0, 1, 1], [], []>} : vector<8x8xbf16>, vector<8x512xbf16>, vector<8x512xf32> -> vector<8x512xf32>
    %cst_10 = arith.constant 0.000000e+00 : bf16
    %21 = vector.broadcast %cst_10 : bf16 to vector<8x16xbf16>
    %22 = vector.extract_strided_slice %2 {offsets = [0, 0], sizes = [8, 496], strides = [1, 1]} : vector<8x512xbf16> to vector<8x496xbf16>
    %23 = tpu.concatenate %21, %22 in 1 : vector<8x16xbf16>, vector<8x496xbf16> -> vector<8x512xbf16>
    %24 = vector.broadcast %6 : vector<1x512xbf16> to vector<8x512xbf16>
    %25 = arith.mulf %23, %24 : vector<8x512xbf16>
    %c0_11 = arith.constant 0 : index
    %c1 = arith.constant 1 : index
    %c0_12 = arith.constant 0 : index
    %c0_13 = arith.constant 0 : index
    %26 = vector.load %arg3[%c0_11, %c1, %c0_12, %c0_13] : memref<3x9x8x8xbf16, #tpu.memory_space<vmem>>, vector<1x1x8x8xbf16>
    %27 = vector.shape_cast %26 : vector<1x1x8x8xbf16> to vector<8x8xbf16>
    %cst_14 = arith.constant dense<0.000000e+00> : vector<8x512xf32>
    %28 = tpu.matmul %27, %25, %cst_14 {dimension_numbers = #tpu.dot_dimension_numbers<[1], [0], [0], [1], [0, 0, 1, 1], [], []>} : vector<8x8xbf16>, vector<8x512xbf16>, vector<8x512xf32> -> vector<8x512xf32>
    %29 = arith.addf %20, %28 : vector<8x512xf32>
    %cst_15 = arith.constant 0.000000e+00 : bf16
    %30 = vector.broadcast %cst_15 : bf16 to vector<8x15xbf16>
    %31 = vector.extract_strided_slice %2 {offsets = [0, 0], sizes = [8, 497], strides = [1, 1]} : vector<8x512xbf16> to vector<8x497xbf16>
    %32 = tpu.concatenate %30, %31 in 1 : vector<8x15xbf16>, vector<8x497xbf16> -> vector<8x512xbf16>
    %33 = vector.broadcast %7 : vector<1x512xbf16> to vector<8x512xbf16>
    %34 = arith.mulf %32, %33 : vector<8x512xbf16>
    %c0_16 = arith.constant 0 : index
    %c2 = arith.constant 2 : index
    %c0_17 = arith.constant 0 : index
    %c0_18 = arith.constant 0 : index
    %35 = vector.load %arg3[%c0_16, %c2, %c0_17, %c0_18] : memref<3x9x8x8xbf16, #tpu.memory_space<vmem>>, vector<1x1x8x8xbf16>
    %36 = vector.shape_cast %35 : vector<1x1x8x8xbf16> to vector<8x8xbf16>
    %cst_19 = arith.constant dense<0.000000e+00> : vector<8x512xf32>
    %37 = tpu.matmul %36, %34, %cst_19 {dimension_numbers = #tpu.dot_dimension_numbers<[1], [0], [0], [1], [0, 0, 1, 1], [], []>} : vector<8x8xbf16>, vector<8x512xbf16>, vector<8x512xf32> -> vector<8x512xf32>
    %38 = arith.addf %29, %37 : vector<8x512xf32>
    %cst_20 = arith.constant 0.000000e+00 : bf16
    %39 = vector.broadcast %cst_20 : bf16 to vector<8x1xbf16>
    %40 = vector.extract_strided_slice %2 {offsets = [0, 0], sizes = [8, 511], strides = [1, 1]} : vector<8x512xbf16> to vector<8x511xbf16>
    %41 = tpu.concatenate %39, %40 in 1 : vector<8x1xbf16>, vector<8x511xbf16> -> vector<8x512xbf16>
    %42 = vector.broadcast %8 : vector<1x512xbf16> to vector<8x512xbf16>
    %43 = arith.mulf %41, %42 : vector<8x512xbf16>
    %c0_21 = arith.constant 0 : index
    %c3 = arith.constant 3 : index
    %c0_22 = arith.constant 0 : index
    %c0_23 = arith.constant 0 : index
    %44 = vector.load %arg3[%c0_21, %c3, %c0_22, %c0_23] : memref<3x9x8x8xbf16, #tpu.memory_space<vmem>>, vector<1x1x8x8xbf16>
    %45 = vector.shape_cast %44 : vector<1x1x8x8xbf16> to vector<8x8xbf16>
    %cst_24 = arith.constant dense<0.000000e+00> : vector<8x512xf32>
    %46 = tpu.matmul %45, %43, %cst_24 {dimension_numbers = #tpu.dot_dimension_numbers<[1], [0], [0], [1], [0, 0, 1, 1], [], []>} : vector<8x8xbf16>, vector<8x512xbf16>, vector<8x512xf32> -> vector<8x512xf32>
    %47 = arith.addf %38, %46 : vector<8x512xf32>
    %c0_25 = arith.constant 0 : index
    %c4 = arith.constant 4 : index
    %c0_26 = arith.constant 0 : index
    %c0_27 = arith.constant 0 : index
    %48 = vector.load %arg3[%c0_25, %c4, %c0_26, %c0_27] : memref<3x9x8x8xbf16, #tpu.memory_space<vmem>>, vector<1x1x8x8xbf16>
    %49 = vector.shape_cast %48 : vector<1x1x8x8xbf16> to vector<8x8xbf16>
    %cst_28 = arith.constant dense<0.000000e+00> : vector<8x512xf32>
    %50 = tpu.matmul %49, %2, %cst_28 {dimension_numbers = #tpu.dot_dimension_numbers<[1], [0], [0], [1], [0, 0, 1, 1], [], []>} : vector<8x8xbf16>, vector<8x512xbf16>, vector<8x512xf32> -> vector<8x512xf32>
    %51 = arith.addf %47, %50 : vector<8x512xf32>
    %52 = vector.extract_strided_slice %2 {offsets = [0, 1], sizes = [8, 511], strides = [1, 1]} : vector<8x512xbf16> to vector<8x511xbf16>
    %cst_29 = arith.constant 0.000000e+00 : bf16
    %53 = vector.broadcast %cst_29 : bf16 to vector<8x1xbf16>
    %54 = tpu.concatenate %52, %53 in 1 : vector<8x511xbf16>, vector<8x1xbf16> -> vector<8x512xbf16>
    %55 = vector.broadcast %9 : vector<1x512xbf16> to vector<8x512xbf16>
    %56 = arith.mulf %54, %55 : vector<8x512xbf16>
    %c0_30 = arith.constant 0 : index
    %c5 = arith.constant 5 : index
    %c0_31 = arith.constant 0 : index
    %c0_32 = arith.constant 0 : index
    %57 = vector.load %arg3[%c0_30, %c5, %c0_31, %c0_32] : memref<3x9x8x8xbf16, #tpu.memory_space<vmem>>, vector<1x1x8x8xbf16>
    %58 = vector.shape_cast %57 : vector<1x1x8x8xbf16> to vector<8x8xbf16>
    %cst_33 = arith.constant dense<0.000000e+00> : vector<8x512xf32>
    %59 = tpu.matmul %58, %56, %cst_33 {dimension_numbers = #tpu.dot_dimension_numbers<[1], [0], [0], [1], [0, 0, 1, 1], [], []>} : vector<8x8xbf16>, vector<8x512xbf16>, vector<8x512xf32> -> vector<8x512xf32>
    %60 = arith.addf %51, %59 : vector<8x512xf32>
    %61 = vector.extract_strided_slice %2 {offsets = [0, 15], sizes = [8, 497], strides = [1, 1]} : vector<8x512xbf16> to vector<8x497xbf16>
    %cst_34 = arith.constant 0.000000e+00 : bf16
    %62 = vector.broadcast %cst_34 : bf16 to vector<8x15xbf16>
    %63 = tpu.concatenate %61, %62 in 1 : vector<8x497xbf16>, vector<8x15xbf16> -> vector<8x512xbf16>
    %64 = vector.broadcast %10 : vector<1x512xbf16> to vector<8x512xbf16>
    %65 = arith.mulf %63, %64 : vector<8x512xbf16>
    %c0_35 = arith.constant 0 : index
    %c6 = arith.constant 6 : index
    %c0_36 = arith.constant 0 : index
    %c0_37 = arith.constant 0 : index
    %66 = vector.load %arg3[%c0_35, %c6, %c0_36, %c0_37] : memref<3x9x8x8xbf16, #tpu.memory_space<vmem>>, vector<1x1x8x8xbf16>
    %67 = vector.shape_cast %66 : vector<1x1x8x8xbf16> to vector<8x8xbf16>
    %cst_38 = arith.constant dense<0.000000e+00> : vector<8x512xf32>
    %68 = tpu.matmul %67, %65, %cst_38 {dimension_numbers = #tpu.dot_dimension_numbers<[1], [0], [0], [1], [0, 0, 1, 1], [], []>} : vector<8x8xbf16>, vector<8x512xbf16>, vector<8x512xf32> -> vector<8x512xf32>
    %69 = arith.addf %60, %68 : vector<8x512xf32>
    %70 = vector.extract_strided_slice %2 {offsets = [0, 16], sizes = [8, 496], strides = [1, 1]} : vector<8x512xbf16> to vector<8x496xbf16>
    %cst_39 = arith.constant 0.000000e+00 : bf16
    %71 = vector.broadcast %cst_39 : bf16 to vector<8x16xbf16>
    %72 = tpu.concatenate %70, %71 in 1 : vector<8x496xbf16>, vector<8x16xbf16> -> vector<8x512xbf16>
    %73 = vector.broadcast %11 : vector<1x512xbf16> to vector<8x512xbf16>
    %74 = arith.mulf %72, %73 : vector<8x512xbf16>
    %c0_40 = arith.constant 0 : index
    %c7 = arith.constant 7 : index
    %c0_41 = arith.constant 0 : index
    %c0_42 = arith.constant 0 : index
    %75 = vector.load %arg3[%c0_40, %c7, %c0_41, %c0_42] : memref<3x9x8x8xbf16, #tpu.memory_space<vmem>>, vector<1x1x8x8xbf16>
    %76 = vector.shape_cast %75 : vector<1x1x8x8xbf16> to vector<8x8xbf16>
    %cst_43 = arith.constant dense<0.000000e+00> : vector<8x512xf32>
    %77 = tpu.matmul %76, %74, %cst_43 {dimension_numbers = #tpu.dot_dimension_numbers<[1], [0], [0], [1], [0, 0, 1, 1], [], []>} : vector<8x8xbf16>, vector<8x512xbf16>, vector<8x512xf32> -> vector<8x512xf32>
    %78 = arith.addf %69, %77 : vector<8x512xf32>
    %79 = vector.extract_strided_slice %2 {offsets = [0, 17], sizes = [8, 495], strides = [1, 1]} : vector<8x512xbf16> to vector<8x495xbf16>
    %cst_44 = arith.constant 0.000000e+00 : bf16
    %80 = vector.broadcast %cst_44 : bf16 to vector<8x17xbf16>
    %81 = tpu.concatenate %79, %80 in 1 : vector<8x495xbf16>, vector<8x17xbf16> -> vector<8x512xbf16>
    %82 = vector.broadcast %12 : vector<1x512xbf16> to vector<8x512xbf16>
    %83 = arith.mulf %81, %82 : vector<8x512xbf16>
    %c0_45 = arith.constant 0 : index
    %c8 = arith.constant 8 : index
    %c0_46 = arith.constant 0 : index
    %c0_47 = arith.constant 0 : index
    %84 = vector.load %arg3[%c0_45, %c8, %c0_46, %c0_47] : memref<3x9x8x8xbf16, #tpu.memory_space<vmem>>, vector<1x1x8x8xbf16>
    %85 = vector.shape_cast %84 : vector<1x1x8x8xbf16> to vector<8x8xbf16>
    %cst_48 = arith.constant dense<0.000000e+00> : vector<8x512xf32>
    %86 = tpu.matmul %85, %83, %cst_48 {dimension_numbers = #tpu.dot_dimension_numbers<[1], [0], [0], [1], [0, 0, 1, 1], [], []>} : vector<8x8xbf16>, vector<8x512xbf16>, vector<8x512xf32> -> vector<8x512xf32>
    %87 = arith.addf %78, %86 : vector<8x512xf32>
    %cst_49 = arith.constant 0.000000e+00 : f32
    %88 = vector.broadcast %cst_49 : f32 to vector<8x512xf32>
    %89 = arith.maximumf %87, %88 : vector<8x512xf32>
    %90 = arith.truncf %89 : vector<8x512xf32> to vector<8x512xbf16>
    %cst_50 = arith.constant dense<0.000000e+00> : vector<8x512xf32>
    %91 = tpu.matmul %4, %90, %cst_50 {dimension_numbers = #tpu.dot_dimension_numbers<[1], [0], [0], [1], [0, 0, 1, 1], [], []>} : vector<8x8xbf16>, vector<8x512xbf16>, vector<8x512xf32> -> vector<8x512xf32>
    %c0_51 = arith.constant 0 : index
    %c0_52 = arith.constant 0 : index
    %c0_53 = arith.constant 0 : index
    %92 = vector.load %arg5[%c0_51, %c0_52, %c0_53] : memref<3x8x1xf32, #tpu.memory_space<vmem>>, vector<1x8x1xf32>
    %93 = vector.shape_cast %92 : vector<1x8x1xf32> to vector<8x1xf32>
    %94 = vector.broadcast %93 : vector<8x1xf32> to vector<8x512xf32>
    %95 = arith.addf %91, %94 : vector<8x512xf32>
    %96 = arith.negf %95 : vector<8x512xf32>
    %97 = math.exp %96 : vector<8x512xf32>
    %cst_54 = arith.constant 1.000000e+00 : f32
    %98 = vector.broadcast %cst_54 : f32 to vector<8x512xf32>
    %99 = arith.addf %98, %97 : vector<8x512xf32>
    %100 = arith.divf %98, %99 : vector<8x512xf32>
    %101 = arith.extf %1 : vector<8x512xbf16> to vector<8x512xf32>
    %102 = arith.mulf %101, %100 : vector<8x512xf32>
    %103 = arith.truncf %102 : vector<8x512xf32> to vector<8x512xbf16>
    %cst_55 = arith.constant 0.000000e+00 : bf16
    %104 = vector.broadcast %cst_55 : bf16 to vector<8x17xbf16>
    %105 = vector.extract_strided_slice %103 {offsets = [0, 0], sizes = [8, 495], strides = [1, 1]} : vector<8x512xbf16> to vector<8x495xbf16>
    %106 = tpu.concatenate %104, %105 in 1 : vector<8x17xbf16>, vector<8x495xbf16> -> vector<8x512xbf16>
    %107 = vector.broadcast %5 : vector<1x512xbf16> to vector<8x512xbf16>
    %108 = arith.mulf %106, %107 : vector<8x512xbf16>
    %c1_56 = arith.constant 1 : index
    %c0_57 = arith.constant 0 : index
    %c0_58 = arith.constant 0 : index
    %c0_59 = arith.constant 0 : index
    %109 = vector.load %arg3[%c1_56, %c0_57, %c0_58, %c0_59] : memref<3x9x8x8xbf16, #tpu.memory_space<vmem>>, vector<1x1x8x8xbf16>
    %110 = vector.shape_cast %109 : vector<1x1x8x8xbf16> to vector<8x8xbf16>
    %cst_60 = arith.constant dense<0.000000e+00> : vector<8x512xf32>
    %111 = tpu.matmul %110, %108, %cst_60 {dimension_numbers = #tpu.dot_dimension_numbers<[1], [0], [0], [1], [0, 0, 1, 1], [], []>} : vector<8x8xbf16>, vector<8x512xbf16>, vector<8x512xf32> -> vector<8x512xf32>
    %cst_61 = arith.constant 0.000000e+00 : bf16
    %112 = vector.broadcast %cst_61 : bf16 to vector<8x16xbf16>
    %113 = vector.extract_strided_slice %103 {offsets = [0, 0], sizes = [8, 496], strides = [1, 1]} : vector<8x512xbf16> to vector<8x496xbf16>
    %114 = tpu.concatenate %112, %113 in 1 : vector<8x16xbf16>, vector<8x496xbf16> -> vector<8x512xbf16>
    %115 = vector.broadcast %6 : vector<1x512xbf16> to vector<8x512xbf16>
    %116 = arith.mulf %114, %115 : vector<8x512xbf16>
    %c1_62 = arith.constant 1 : index
    %c1_63 = arith.constant 1 : index
    %c0_64 = arith.constant 0 : index
    %c0_65 = arith.constant 0 : index
    %117 = vector.load %arg3[%c1_62, %c1_63, %c0_64, %c0_65] : memref<3x9x8x8xbf16, #tpu.memory_space<vmem>>, vector<1x1x8x8xbf16>
    %118 = vector.shape_cast %117 : vector<1x1x8x8xbf16> to vector<8x8xbf16>
    %cst_66 = arith.constant dense<0.000000e+00> : vector<8x512xf32>
    %119 = tpu.matmul %118, %116, %cst_66 {dimension_numbers = #tpu.dot_dimension_numbers<[1], [0], [0], [1], [0, 0, 1, 1], [], []>} : vector<8x8xbf16>, vector<8x512xbf16>, vector<8x512xf32> -> vector<8x512xf32>
    %120 = arith.addf %111, %119 : vector<8x512xf32>
    %cst_67 = arith.constant 0.000000e+00 : bf16
    %121 = vector.broadcast %cst_67 : bf16 to vector<8x15xbf16>
    %122 = vector.extract_strided_slice %103 {offsets = [0, 0], sizes = [8, 497], strides = [1, 1]} : vector<8x512xbf16> to vector<8x497xbf16>
    %123 = tpu.concatenate %121, %122 in 1 : vector<8x15xbf16>, vector<8x497xbf16> -> vector<8x512xbf16>
    %124 = vector.broadcast %7 : vector<1x512xbf16> to vector<8x512xbf16>
    %125 = arith.mulf %123, %124 : vector<8x512xbf16>
    %c1_68 = arith.constant 1 : index
    %c2_69 = arith.constant 2 : index
    %c0_70 = arith.constant 0 : index
    %c0_71 = arith.constant 0 : index
    %126 = vector.load %arg3[%c1_68, %c2_69, %c0_70, %c0_71] : memref<3x9x8x8xbf16, #tpu.memory_space<vmem>>, vector<1x1x8x8xbf16>
    %127 = vector.shape_cast %126 : vector<1x1x8x8xbf16> to vector<8x8xbf16>
    %cst_72 = arith.constant dense<0.000000e+00> : vector<8x512xf32>
    %128 = tpu.matmul %127, %125, %cst_72 {dimension_numbers = #tpu.dot_dimension_numbers<[1], [0], [0], [1], [0, 0, 1, 1], [], []>} : vector<8x8xbf16>, vector<8x512xbf16>, vector<8x512xf32> -> vector<8x512xf32>
    %129 = arith.addf %120, %128 : vector<8x512xf32>
    %cst_73 = arith.constant 0.000000e+00 : bf16
    %130 = vector.broadcast %cst_73 : bf16 to vector<8x1xbf16>
    %131 = vector.extract_strided_slice %103 {offsets = [0, 0], sizes = [8, 511], strides = [1, 1]} : vector<8x512xbf16> to vector<8x511xbf16>
    %132 = tpu.concatenate %130, %131 in 1 : vector<8x1xbf16>, vector<8x511xbf16> -> vector<8x512xbf16>
    %133 = vector.broadcast %8 : vector<1x512xbf16> to vector<8x512xbf16>
    %134 = arith.mulf %132, %133 : vector<8x512xbf16>
    %c1_74 = arith.constant 1 : index
    %c3_75 = arith.constant 3 : index
    %c0_76 = arith.constant 0 : index
    %c0_77 = arith.constant 0 : index
    %135 = vector.load %arg3[%c1_74, %c3_75, %c0_76, %c0_77] : memref<3x9x8x8xbf16, #tpu.memory_space<vmem>>, vector<1x1x8x8xbf16>
    %136 = vector.shape_cast %135 : vector<1x1x8x8xbf16> to vector<8x8xbf16>
    %cst_78 = arith.constant dense<0.000000e+00> : vector<8x512xf32>
    %137 = tpu.matmul %136, %134, %cst_78 {dimension_numbers = #tpu.dot_dimension_numbers<[1], [0], [0], [1], [0, 0, 1, 1], [], []>} : vector<8x8xbf16>, vector<8x512xbf16>, vector<8x512xf32> -> vector<8x512xf32>
    %138 = arith.addf %129, %137 : vector<8x512xf32>
    %c1_79 = arith.constant 1 : index
    %c4_80 = arith.constant 4 : index
    %c0_81 = arith.constant 0 : index
    %c0_82 = arith.constant 0 : index
    %139 = vector.load %arg3[%c1_79, %c4_80, %c0_81, %c0_82] : memref<3x9x8x8xbf16, #tpu.memory_space<vmem>>, vector<1x1x8x8xbf16>
    %140 = vector.shape_cast %139 : vector<1x1x8x8xbf16> to vector<8x8xbf16>
    %cst_83 = arith.constant dense<0.000000e+00> : vector<8x512xf32>
    %141 = tpu.matmul %140, %103, %cst_83 {dimension_numbers = #tpu.dot_dimension_numbers<[1], [0], [0], [1], [0, 0, 1, 1], [], []>} : vector<8x8xbf16>, vector<8x512xbf16>, vector<8x512xf32> -> vector<8x512xf32>
    %142 = arith.addf %138, %141 : vector<8x512xf32>
    %143 = vector.extract_strided_slice %103 {offsets = [0, 1], sizes = [8, 511], strides = [1, 1]} : vector<8x512xbf16> to vector<8x511xbf16>
    %cst_84 = arith.constant 0.000000e+00 : bf16
    %144 = vector.broadcast %cst_84 : bf16 to vector<8x1xbf16>
    %145 = tpu.concatenate %143, %144 in 1 : vector<8x511xbf16>, vector<8x1xbf16> -> vector<8x512xbf16>
    %146 = vector.broadcast %9 : vector<1x512xbf16> to vector<8x512xbf16>
    %147 = arith.mulf %145, %146 : vector<8x512xbf16>
    %c1_85 = arith.constant 1 : index
    %c5_86 = arith.constant 5 : index
    %c0_87 = arith.constant 0 : index
    %c0_88 = arith.constant 0 : index
    %148 = vector.load %arg3[%c1_85, %c5_86, %c0_87, %c0_88] : memref<3x9x8x8xbf16, #tpu.memory_space<vmem>>, vector<1x1x8x8xbf16>
    %149 = vector.shape_cast %148 : vector<1x1x8x8xbf16> to vector<8x8xbf16>
    %cst_89 = arith.constant dense<0.000000e+00> : vector<8x512xf32>
    %150 = tpu.matmul %149, %147, %cst_89 {dimension_numbers = #tpu.dot_dimension_numbers<[1], [0], [0], [1], [0, 0, 1, 1], [], []>} : vector<8x8xbf16>, vector<8x512xbf16>, vector<8x512xf32> -> vector<8x512xf32>
    %151 = arith.addf %142, %150 : vector<8x512xf32>
    %152 = vector.extract_strided_slice %103 {offsets = [0, 15], sizes = [8, 497], strides = [1, 1]} : vector<8x512xbf16> to vector<8x497xbf16>
    %cst_90 = arith.constant 0.000000e+00 : bf16
    %153 = vector.broadcast %cst_90 : bf16 to vector<8x15xbf16>
    %154 = tpu.concatenate %152, %153 in 1 : vector<8x497xbf16>, vector<8x15xbf16> -> vector<8x512xbf16>
    %155 = vector.broadcast %10 : vector<1x512xbf16> to vector<8x512xbf16>
    %156 = arith.mulf %154, %155 : vector<8x512xbf16>
    %c1_91 = arith.constant 1 : index
    %c6_92 = arith.constant 6 : index
    %c0_93 = arith.constant 0 : index
    %c0_94 = arith.constant 0 : index
    %157 = vector.load %arg3[%c1_91, %c6_92, %c0_93, %c0_94] : memref<3x9x8x8xbf16, #tpu.memory_space<vmem>>, vector<1x1x8x8xbf16>
    %158 = vector.shape_cast %157 : vector<1x1x8x8xbf16> to vector<8x8xbf16>
    %cst_95 = arith.constant dense<0.000000e+00> : vector<8x512xf32>
    %159 = tpu.matmul %158, %156, %cst_95 {dimension_numbers = #tpu.dot_dimension_numbers<[1], [0], [0], [1], [0, 0, 1, 1], [], []>} : vector<8x8xbf16>, vector<8x512xbf16>, vector<8x512xf32> -> vector<8x512xf32>
    %160 = arith.addf %151, %159 : vector<8x512xf32>
    %161 = vector.extract_strided_slice %103 {offsets = [0, 16], sizes = [8, 496], strides = [1, 1]} : vector<8x512xbf16> to vector<8x496xbf16>
    %cst_96 = arith.constant 0.000000e+00 : bf16
    %162 = vector.broadcast %cst_96 : bf16 to vector<8x16xbf16>
    %163 = tpu.concatenate %161, %162 in 1 : vector<8x496xbf16>, vector<8x16xbf16> -> vector<8x512xbf16>
    %164 = vector.broadcast %11 : vector<1x512xbf16> to vector<8x512xbf16>
    %165 = arith.mulf %163, %164 : vector<8x512xbf16>
    %c1_97 = arith.constant 1 : index
    %c7_98 = arith.constant 7 : index
    %c0_99 = arith.constant 0 : index
    %c0_100 = arith.constant 0 : index
    %166 = vector.load %arg3[%c1_97, %c7_98, %c0_99, %c0_100] : memref<3x9x8x8xbf16, #tpu.memory_space<vmem>>, vector<1x1x8x8xbf16>
    %167 = vector.shape_cast %166 : vector<1x1x8x8xbf16> to vector<8x8xbf16>
    %cst_101 = arith.constant dense<0.000000e+00> : vector<8x512xf32>
    %168 = tpu.matmul %167, %165, %cst_101 {dimension_numbers = #tpu.dot_dimension_numbers<[1], [0], [0], [1], [0, 0, 1, 1], [], []>} : vector<8x8xbf16>, vector<8x512xbf16>, vector<8x512xf32> -> vector<8x512xf32>
    %169 = arith.addf %160, %168 : vector<8x512xf32>
    %170 = vector.extract_strided_slice %103 {offsets = [0, 17], sizes = [8, 495], strides = [1, 1]} : vector<8x512xbf16> to vector<8x495xbf16>
    %cst_102 = arith.constant 0.000000e+00 : bf16
    %171 = vector.broadcast %cst_102 : bf16 to vector<8x17xbf16>
    %172 = tpu.concatenate %170, %171 in 1 : vector<8x495xbf16>, vector<8x17xbf16> -> vector<8x512xbf16>
    %173 = vector.broadcast %12 : vector<1x512xbf16> to vector<8x512xbf16>
    %174 = arith.mulf %172, %173 : vector<8x512xbf16>
    %c1_103 = arith.constant 1 : index
    %c8_104 = arith.constant 8 : index
    %c0_105 = arith.constant 0 : index
    %c0_106 = arith.constant 0 : index
    %175 = vector.load %arg3[%c1_103, %c8_104, %c0_105, %c0_106] : memref<3x9x8x8xbf16, #tpu.memory_space<vmem>>, vector<1x1x8x8xbf16>
    %176 = vector.shape_cast %175 : vector<1x1x8x8xbf16> to vector<8x8xbf16>
    %cst_107 = arith.constant dense<0.000000e+00> : vector<8x512xf32>
    %177 = tpu.matmul %176, %174, %cst_107 {dimension_numbers = #tpu.dot_dimension_numbers<[1], [0], [0], [1], [0, 0, 1, 1], [], []>} : vector<8x8xbf16>, vector<8x512xbf16>, vector<8x512xf32> -> vector<8x512xf32>
    %178 = arith.addf %169, %177 : vector<8x512xf32>
    %c1_108 = arith.constant 1 : index
    %c0_109 = arith.constant 0 : index
    %c0_110 = arith.constant 0 : index
    %179 = vector.load %arg5[%c1_108, %c0_109, %c0_110] : memref<3x8x1xf32, #tpu.memory_space<vmem>>, vector<1x8x1xf32>
    %180 = vector.shape_cast %179 : vector<1x8x1xf32> to vector<8x1xf32>
    %181 = vector.broadcast %180 : vector<8x1xf32> to vector<8x512xf32>
    %182 = arith.addf %178, %181 : vector<8x512xf32>
    %cst_111 = arith.constant 0.000000e+00 : f32
    %183 = vector.broadcast %cst_111 : f32 to vector<8x512xf32>
    %184 = arith.maximumf %182, %183 : vector<8x512xf32>
    %185 = arith.truncf %184 : vector<8x512xf32> to vector<8x512xbf16>
    %cst_112 = arith.constant 0.000000e+00 : bf16
    %186 = vector.broadcast %cst_112 : bf16 to vector<8x17xbf16>
    %187 = vector.extract_strided_slice %185 {offsets = [0, 0], sizes = [8, 495], strides = [1, 1]} : vector<8x512xbf16> to vector<8x495xbf16>
    %188 = tpu.concatenate %186, %187 in 1 : vector<8x17xbf16>, vector<8x495xbf16> -> vector<8x512xbf16>
    %189 = vector.broadcast %5 : vector<1x512xbf16> to vector<8x512xbf16>
    %190 = arith.mulf %188, %189 : vector<8x512xbf16>
    %c2_113 = arith.constant 2 : index
    %c0_114 = arith.constant 0 : index
    %c0_115 = arith.constant 0 : index
    %c0_116 = arith.constant 0 : index
    %191 = vector.load %arg3[%c2_113, %c0_114, %c0_115, %c0_116] : memref<3x9x8x8xbf16, #tpu.memory_space<vmem>>, vector<1x1x8x8xbf16>
    %192 = vector.shape_cast %191 : vector<1x1x8x8xbf16> to vector<8x8xbf16>
    %cst_117 = arith.constant dense<0.000000e+00> : vector<8x512xf32>
    %193 = tpu.matmul %192, %190, %cst_117 {dimension_numbers = #tpu.dot_dimension_numbers<[1], [0], [0], [1], [0, 0, 1, 1], [], []>} : vector<8x8xbf16>, vector<8x512xbf16>, vector<8x512xf32> -> vector<8x512xf32>
    %cst_118 = arith.constant 0.000000e+00 : bf16
    %194 = vector.broadcast %cst_118 : bf16 to vector<8x16xbf16>
    %195 = vector.extract_strided_slice %185 {offsets = [0, 0], sizes = [8, 496], strides = [1, 1]} : vector<8x512xbf16> to vector<8x496xbf16>
    %196 = tpu.concatenate %194, %195 in 1 : vector<8x16xbf16>, vector<8x496xbf16> -> vector<8x512xbf16>
    %197 = vector.broadcast %6 : vector<1x512xbf16> to vector<8x512xbf16>
    %198 = arith.mulf %196, %197 : vector<8x512xbf16>
    %c2_119 = arith.constant 2 : index
    %c1_120 = arith.constant 1 : index
    %c0_121 = arith.constant 0 : index
    %c0_122 = arith.constant 0 : index
    %199 = vector.load %arg3[%c2_119, %c1_120, %c0_121, %c0_122] : memref<3x9x8x8xbf16, #tpu.memory_space<vmem>>, vector<1x1x8x8xbf16>
    %200 = vector.shape_cast %199 : vector<1x1x8x8xbf16> to vector<8x8xbf16>
    %cst_123 = arith.constant dense<0.000000e+00> : vector<8x512xf32>
    %201 = tpu.matmul %200, %198, %cst_123 {dimension_numbers = #tpu.dot_dimension_numbers<[1], [0], [0], [1], [0, 0, 1, 1], [], []>} : vector<8x8xbf16>, vector<8x512xbf16>, vector<8x512xf32> -> vector<8x512xf32>
    %202 = arith.addf %193, %201 : vector<8x512xf32>
    %cst_124 = arith.constant 0.000000e+00 : bf16
    %203 = vector.broadcast %cst_124 : bf16 to vector<8x15xbf16>
    %204 = vector.extract_strided_slice %185 {offsets = [0, 0], sizes = [8, 497], strides = [1, 1]} : vector<8x512xbf16> to vector<8x497xbf16>
    %205 = tpu.concatenate %203, %204 in 1 : vector<8x15xbf16>, vector<8x497xbf16> -> vector<8x512xbf16>
    %206 = vector.broadcast %7 : vector<1x512xbf16> to vector<8x512xbf16>
    %207 = arith.mulf %205, %206 : vector<8x512xbf16>
    %c2_125 = arith.constant 2 : index
    %c2_126 = arith.constant 2 : index
    %c0_127 = arith.constant 0 : index
    %c0_128 = arith.constant 0 : index
    %208 = vector.load %arg3[%c2_125, %c2_126, %c0_127, %c0_128] : memref<3x9x8x8xbf16, #tpu.memory_space<vmem>>, vector<1x1x8x8xbf16>
    %209 = vector.shape_cast %208 : vector<1x1x8x8xbf16> to vector<8x8xbf16>
    %cst_129 = arith.constant dense<0.000000e+00> : vector<8x512xf32>
    %210 = tpu.matmul %209, %207, %cst_129 {dimension_numbers = #tpu.dot_dimension_numbers<[1], [0], [0], [1], [0, 0, 1, 1], [], []>} : vector<8x8xbf16>, vector<8x512xbf16>, vector<8x512xf32> -> vector<8x512xf32>
    %211 = arith.addf %202, %210 : vector<8x512xf32>
    %cst_130 = arith.constant 0.000000e+00 : bf16
    %212 = vector.broadcast %cst_130 : bf16 to vector<8x1xbf16>
    %213 = vector.extract_strided_slice %185 {offsets = [0, 0], sizes = [8, 511], strides = [1, 1]} : vector<8x512xbf16> to vector<8x511xbf16>
    %214 = tpu.concatenate %212, %213 in 1 : vector<8x1xbf16>, vector<8x511xbf16> -> vector<8x512xbf16>
    %215 = vector.broadcast %8 : vector<1x512xbf16> to vector<8x512xbf16>
    %216 = arith.mulf %214, %215 : vector<8x512xbf16>
    %c2_131 = arith.constant 2 : index
    %c3_132 = arith.constant 3 : index
    %c0_133 = arith.constant 0 : index
    %c0_134 = arith.constant 0 : index
    %217 = vector.load %arg3[%c2_131, %c3_132, %c0_133, %c0_134] : memref<3x9x8x8xbf16, #tpu.memory_space<vmem>>, vector<1x1x8x8xbf16>
    %218 = vector.shape_cast %217 : vector<1x1x8x8xbf16> to vector<8x8xbf16>
    %cst_135 = arith.constant dense<0.000000e+00> : vector<8x512xf32>
    %219 = tpu.matmul %218, %216, %cst_135 {dimension_numbers = #tpu.dot_dimension_numbers<[1], [0], [0], [1], [0, 0, 1, 1], [], []>} : vector<8x8xbf16>, vector<8x512xbf16>, vector<8x512xf32> -> vector<8x512xf32>
    %220 = arith.addf %211, %219 : vector<8x512xf32>
    %c2_136 = arith.constant 2 : index
    %c4_137 = arith.constant 4 : index
    %c0_138 = arith.constant 0 : index
    %c0_139 = arith.constant 0 : index
    %221 = vector.load %arg3[%c2_136, %c4_137, %c0_138, %c0_139] : memref<3x9x8x8xbf16, #tpu.memory_space<vmem>>, vector<1x1x8x8xbf16>
    %222 = vector.shape_cast %221 : vector<1x1x8x8xbf16> to vector<8x8xbf16>
    %cst_140 = arith.constant dense<0.000000e+00> : vector<8x512xf32>
    %223 = tpu.matmul %222, %185, %cst_140 {dimension_numbers = #tpu.dot_dimension_numbers<[1], [0], [0], [1], [0, 0, 1, 1], [], []>} : vector<8x8xbf16>, vector<8x512xbf16>, vector<8x512xf32> -> vector<8x512xf32>
    %224 = arith.addf %220, %223 : vector<8x512xf32>
    %225 = vector.extract_strided_slice %185 {offsets = [0, 1], sizes = [8, 511], strides = [1, 1]} : vector<8x512xbf16> to vector<8x511xbf16>
    %cst_141 = arith.constant 0.000000e+00 : bf16
    %226 = vector.broadcast %cst_141 : bf16 to vector<8x1xbf16>
    %227 = tpu.concatenate %225, %226 in 1 : vector<8x511xbf16>, vector<8x1xbf16> -> vector<8x512xbf16>
    %228 = vector.broadcast %9 : vector<1x512xbf16> to vector<8x512xbf16>
    %229 = arith.mulf %227, %228 : vector<8x512xbf16>
    %c2_142 = arith.constant 2 : index
    %c5_143 = arith.constant 5 : index
    %c0_144 = arith.constant 0 : index
    %c0_145 = arith.constant 0 : index
    %230 = vector.load %arg3[%c2_142, %c5_143, %c0_144, %c0_145] : memref<3x9x8x8xbf16, #tpu.memory_space<vmem>>, vector<1x1x8x8xbf16>
    %231 = vector.shape_cast %230 : vector<1x1x8x8xbf16> to vector<8x8xbf16>
    %cst_146 = arith.constant dense<0.000000e+00> : vector<8x512xf32>
    %232 = tpu.matmul %231, %229, %cst_146 {dimension_numbers = #tpu.dot_dimension_numbers<[1], [0], [0], [1], [0, 0, 1, 1], [], []>} : vector<8x8xbf16>, vector<8x512xbf16>, vector<8x512xf32> -> vector<8x512xf32>
    %233 = arith.addf %224, %232 : vector<8x512xf32>
    %234 = vector.extract_strided_slice %185 {offsets = [0, 15], sizes = [8, 497], strides = [1, 1]} : vector<8x512xbf16> to vector<8x497xbf16>
    %cst_147 = arith.constant 0.000000e+00 : bf16
    %235 = vector.broadcast %cst_147 : bf16 to vector<8x15xbf16>
    %236 = tpu.concatenate %234, %235 in 1 : vector<8x497xbf16>, vector<8x15xbf16> -> vector<8x512xbf16>
    %237 = vector.broadcast %10 : vector<1x512xbf16> to vector<8x512xbf16>
    %238 = arith.mulf %236, %237 : vector<8x512xbf16>
    %c2_148 = arith.constant 2 : index
    %c6_149 = arith.constant 6 : index
    %c0_150 = arith.constant 0 : index
    %c0_151 = arith.constant 0 : index
    %239 = vector.load %arg3[%c2_148, %c6_149, %c0_150, %c0_151] : memref<3x9x8x8xbf16, #tpu.memory_space<vmem>>, vector<1x1x8x8xbf16>
    %240 = vector.shape_cast %239 : vector<1x1x8x8xbf16> to vector<8x8xbf16>
    %cst_152 = arith.constant dense<0.000000e+00> : vector<8x512xf32>
    %241 = tpu.matmul %240, %238, %cst_152 {dimension_numbers = #tpu.dot_dimension_numbers<[1], [0], [0], [1], [0, 0, 1, 1], [], []>} : vector<8x8xbf16>, vector<8x512xbf16>, vector<8x512xf32> -> vector<8x512xf32>
    %242 = arith.addf %233, %241 : vector<8x512xf32>
    %243 = vector.extract_strided_slice %185 {offsets = [0, 16], sizes = [8, 496], strides = [1, 1]} : vector<8x512xbf16> to vector<8x496xbf16>
    %cst_153 = arith.constant 0.000000e+00 : bf16
    %244 = vector.broadcast %cst_153 : bf16 to vector<8x16xbf16>
    %245 = tpu.concatenate %243, %244 in 1 : vector<8x496xbf16>, vector<8x16xbf16> -> vector<8x512xbf16>
    %246 = vector.broadcast %11 : vector<1x512xbf16> to vector<8x512xbf16>
    %247 = arith.mulf %245, %246 : vector<8x512xbf16>
    %c2_154 = arith.constant 2 : index
    %c7_155 = arith.constant 7 : index
    %c0_156 = arith.constant 0 : index
    %c0_157 = arith.constant 0 : index
    %248 = vector.load %arg3[%c2_154, %c7_155, %c0_156, %c0_157] : memref<3x9x8x8xbf16, #tpu.memory_space<vmem>>, vector<1x1x8x8xbf16>
    %249 = vector.shape_cast %248 : vector<1x1x8x8xbf16> to vector<8x8xbf16>
    %cst_158 = arith.constant dense<0.000000e+00> : vector<8x512xf32>
    %250 = tpu.matmul %249, %247, %cst_158 {dimension_numbers = #tpu.dot_dimension_numbers<[1], [0], [0], [1], [0, 0, 1, 1], [], []>} : vector<8x8xbf16>, vector<8x512xbf16>, vector<8x512xf32> -> vector<8x512xf32>
    %251 = arith.addf %242, %250 : vector<8x512xf32>
    %252 = vector.extract_strided_slice %185 {offsets = [0, 17], sizes = [8, 495], strides = [1, 1]} : vector<8x512xbf16> to vector<8x495xbf16>
    %cst_159 = arith.constant 0.000000e+00 : bf16
    %253 = vector.broadcast %cst_159 : bf16 to vector<8x17xbf16>
    %254 = tpu.concatenate %252, %253 in 1 : vector<8x495xbf16>, vector<8x17xbf16> -> vector<8x512xbf16>
    %255 = vector.broadcast %12 : vector<1x512xbf16> to vector<8x512xbf16>
    %256 = arith.mulf %254, %255 : vector<8x512xbf16>
    %c2_160 = arith.constant 2 : index
    %c8_161 = arith.constant 8 : index
    %c0_162 = arith.constant 0 : index
    %c0_163 = arith.constant 0 : index
    %257 = vector.load %arg3[%c2_160, %c8_161, %c0_162, %c0_163] : memref<3x9x8x8xbf16, #tpu.memory_space<vmem>>, vector<1x1x8x8xbf16>
    %258 = vector.shape_cast %257 : vector<1x1x8x8xbf16> to vector<8x8xbf16>
    %cst_164 = arith.constant dense<0.000000e+00> : vector<8x512xf32>
    %259 = tpu.matmul %258, %256, %cst_164 {dimension_numbers = #tpu.dot_dimension_numbers<[1], [0], [0], [1], [0, 0, 1, 1], [], []>} : vector<8x8xbf16>, vector<8x512xbf16>, vector<8x512xf32> -> vector<8x512xf32>
    %260 = arith.addf %251, %259 : vector<8x512xf32>
    %c2_165 = arith.constant 2 : index
    %c0_166 = arith.constant 0 : index
    %c0_167 = arith.constant 0 : index
    %261 = vector.load %arg5[%c2_165, %c0_166, %c0_167] : memref<3x8x1xf32, #tpu.memory_space<vmem>>, vector<1x8x1xf32>
    %262 = vector.shape_cast %261 : vector<1x8x1xf32> to vector<8x1xf32>
    %263 = vector.broadcast %262 : vector<8x1xf32> to vector<8x512xf32>
    %264 = arith.addf %260, %263 : vector<8x512xf32>
    %265 = arith.negf %264 : vector<8x512xf32>
    %266 = math.exp %265 : vector<8x512xf32>
    %cst_168 = arith.constant 1.000000e+00 : f32
    %267 = vector.broadcast %cst_168 : f32 to vector<8x512xf32>
    %268 = arith.addf %267, %266 : vector<8x512xf32>
    %269 = arith.divf %267, %268 : vector<8x512xf32>
    %270 = arith.mulf %102, %269 : vector<8x512xf32>
    %271 = arith.truncf %270 : vector<8x512xf32> to vector<8x512xbf16>
    %c0_169 = arith.constant 0 : index
    %c0_170 = arith.constant 0 : index
    %272 = vector.load %arg6[%c0_169, %c0_170] : memref<8x512xbf16, #tpu.memory_space<vmem>>, vector<8x512xbf16>
    tpu.vector_store %arg6[%c0_169, %c0_170], %271 {strides = array<i32>} : memref<8x512xbf16, #tpu.memory_space<vmem>>, vector<8x512xbf16>,
    return
  }
  func.func @transform_0(%arg0: i32) -> (i32, i32) {
    %c0_i32 = arith.constant 0 : i32
    %c0_i32_0 = arith.constant 0 : i32
    return %c0_i32, %arg0 : i32, i32
  }
  func.func @transform_1(%arg0: i32) -> (i32, i32) {
    %c0_i32 = arith.constant 0 : i32
    %c0_i32_0 = arith.constant 0 : i32
    %c0_i32_1 = arith.constant 0 : i32
    return %c0_i32, %c0_i32_0 : i32, i32
  }
  func.func @transform_2(%arg0: i32) -> (i32, i32, i32, i32) {
    %c0_i32 = arith.constant 0 : i32
    %c0_i32_0 = arith.constant 0 : i32
    %c0_i32_1 = arith.constant 0 : i32
    %c0_i32_2 = arith.constant 0 : i32
    %c0_i32_3 = arith.constant 0 : i32
    return %c0_i32, %c0_i32_0, %c0_i32_1, %c0_i32_2 : i32, i32, i32, i32
  }
  func.func @transform_3(%arg0: i32) -> (i32, i32) {
    %c0_i32 = arith.constant 0 : i32
    %c0_i32_0 = arith.constant 0 : i32
    %c0_i32_1 = arith.constant 0 : i32
    return %c0_i32, %c0_i32_0 : i32, i32
  }
  func.func @transform_4(%arg0: i32) -> (i32, i32, i32) {
    %c0_i32 = arith.constant 0 : i32
    %c0_i32_0 = arith.constant 0 : i32
    %c0_i32_1 = arith.constant 0 : i32
    %c0_i32_2 = arith.constant 0 : i32
    return %c0_i32, %c0_i32_0, %c0_i32_1 : i32, i32, i32
  }
  func.func @transform_5(%arg0: i32) -> (i32, i32) {
    %c0_i32 = arith.constant 0 : i32
    %c0_i32_0 = arith.constant 0 : i32
    return %c0_i32, %arg0 : i32, i32
  }
}

</mosaic_0001>

<bundles_post_ra>
// kernel: ba_block_pallas.1
= control target key start
LH: loop header
LB: loop body
LE: loop exit
PB: predicated region body
PF: predicated region fallthrough
CT: control target
= control target key end

     0   :  { %v4871_v4 = vmov 0   ;;  %s3926_s22 = smov 16   ;;  %s3927_s23 = smov 17   ;;  %v71_v9 = vlaneseq  ;;  %vm109_vm0 = vcmask 130048   ;;  %vm158_vm1 = vcmask 1043456   ;;  %s4865_s0 = inlined_call_operand.vmem [shape: bf16[16,512], index: 0, kind: input, shape index: {}]   ;;  %s4866_s1 = inlined_call_operand.vmem [shape: bf16[8,512], index: 1, kind: input, shape index: {}]   ;;  %s4867_s2 = inlined_call_operand.vmem [shape: bf16[3,9,8,8], index: 2, kind: input, shape index: {}]   ;;  %s4868_s4 = inlined_call_operand.vmem [shape: f32[3,8,1], index: 4, kind: input, shape index: {}]   ;;  %s4869_s3 = inlined_call_operand.vmem [shape: bf16[8,8], index: 3, kind: input, shape index: {}]   ;;  %s4870_s5 = inlined_call_operand.vmem [shape: bf16[8,512], index: 5, kind: output, shape index: {}]  }
   0x1   :  { %v24_v0 = vld [vmem:[%s4865_s0 + $0x18] sm:$0xff]  ;;  %v23_v1 = vld [vmem:[%s4865_s0 + $0x10] sm:$0xff]  ;;  %203 = vmatprep.mubr.bf16.mxu0 %v4871_v4  ;;  %244 = vmatprep.mubr.bf16.mxu1 %v4871_v4  ;;  %s3928_s24 = smov 15   ;;  %s3929_s25 = smov 1   ;;  %v25_v7 = vld [vmem:[%s4866_s1] sm:$0xff]  ;;  %vm46_vm2 = vcmask 138240  }
   0x2   :  { %v3970_v2 = vcombine.low %v24_v0, %v24_v0  ;;  %v3972_v3 = vcombine.low %v23_v1, %v23_v1  ;;  %3883 = vset.pattern.permute.xlu0 %v4871_v4  ;;  %v3981_v5 = vcombine.high %v24_v0, %v24_v0  ;;  %v3983_v6 = vcombine.high %v23_v1, %v23_v1  ;;  %s3930_s26 = smov 127   ;;  %s3931_s27 = smov 113   ;;  %v26_v8 = vld [vmem:[%s4866_s1 + $0x8] sm:$0xff]  ;;  %v3722_v52 = vld [vmem:[%s4867_s2 + $0x4] sm:$0xf] }
   0x3   :  { %3884 = vset.pattern.permute.xlu1 %v4871_v4  ;;  %s3932_s28 = smov 112   ;;  %s3933_s29 = smov 111   ;;  %v3718_v10 = vcombine.low %v25_v7, %v25_v7  ;;  %v3721_v11 = vcombine.high %v26_v8, %v26_v8  ;;  %v3719_v12 = vcombine.high %v25_v7, %v25_v7  ;;  %v3720_v13 = vcombine.low %v26_v8, %v26_v8 }
   0x4   :  { %105 = vrot.lane.b32.xlu1 %v3970_v2, %s3926_s22  ;;  %101 = vrot.lane.b32.xlu0 %v3972_v3, %s3926_s22  ;;  %v4052_v14 = vshrl.u32 %v71_v9, 7  ;;  %vm154_vm3 = vcmask 64512   ;;  %vm358_vm4 = vcmask 121856   ;;  %vm500_vm5 = vcmask 7168  }
   0x5   :  { %v120_v15 = vshrl.u32 %v3718_v10, 16  ;;  %v141_v16 = vshrl.u32 %v3721_v11, 16  ;;  %v127_v17 = vshrl.u32 %v3719_v12, 16  ;;  %v134_v18 = vshrl.u32 %v3720_v13, 16 }
   0x6   :  { %v73_v19 = vsub.s32 0, %v4052_v14  ;;  %v4063_v26 = vpack.i.b16 %v3718_v10, %v3718_v10  ;;  %v4075_v31 = vpack.i.b16 %v3719_v12, %v3719_v12  ;;  %v4084_v37 = vpack.i.b16 %v3720_v13, %v3720_v13  ;;  %v100_v13 = vld [vmem:[%s4867_s2] sm:$0xf] }
   0x7   :  { %v4055_v20 = vpack.i.b16 %v120_v15, %v120_v15  ;;  %v4057_v21 = vpack.i.b16 %v141_v16, %v141_v16  ;;  %v4059_v22 = vpack.i.b16 %v127_v17, %v127_v17  ;;  %v4061_v23 = vpack.i.b16 %v134_v18, %v134_v18 }
   0x8   :  { %107 = vrot.lane.b32.xlu1 %v3981_v5, %s3926_s22  ;;  %103 = vrot.lane.b32.xlu0 %v3983_v6, %s3926_s22  ;;  %v4081_v35 = vrot.slane %v4063_v26, %v73_v19  ;;  %v4089_v41 = vpack.i.b16 %v3721_v11, %v3721_v11  ;;  %v4094_v44 = vrot.slane %v4075_v31, %v73_v19  ;;  %v371_v53 = vsub.s32 1, %v4052_v14 }
   0x9   :  { %v4066_v27 = vrot.slane %v4055_v20, %v73_v19  ;;  %v4070_v29 = vrot.slane %v4057_v21, %v73_v19  ;;  %v4073_v30 = vrot.slane %v4059_v22, %v73_v19  ;;  %v4078_v32 = vrot.slane %v4061_v23, %v73_v19 }
   0xa   :  { %v4110_v56 = vrot.slane %v4084_v37, %v73_v19  ;;  %v4113_v57 = vrot.slane %v4089_v41, %v73_v19  ;;  %v4122_v63 = vrot.slane %v4063_v26, %v371_v53  ;;  %v4128_v7 = vrot.slane %v4075_v31, %v371_v53 }
   0xb   :  { %v4141_v17 = vrot.slane %v4084_v37, %v371_v53  ;;  %v4144_v18 = vrot.slane %v4089_v41, %v371_v53  ;;  %vm745_vm6 = vcmask 1039360   ;;  %vm887_vm7 = vcmask 924672  }
   0xc   :  { %40 = vrot.lane.b32.xlu1 %v3983_v6, %s3927_s23  ;;  %38 = vrot.lane.b32.xlu0 %v3972_v3, %s3927_s23  ;;  %vm1029_vm8 = vcmask 916480   ;;  %vm1171_vm9 = vcmask 908288  }
  0x10   :  { %44 = vrot.lane.b32.xlu1 %v3981_v5, %s3927_s23  ;;  %42 = vrot.lane.b32.xlu0 %v3970_v2, %s3927_s23 }
  0x14   :  { %352 = vrot.lane.b32.xlu1 %v3983_v6, %s3928_s24  ;;  %350 = vrot.lane.b32.xlu0 %v3972_v3, %s3928_s24 }
  0x18   :  { %356 = vrot.lane.b32.xlu1 %v3981_v5, %s3928_s24  ;;  %354 = vrot.lane.b32.xlu0 %v3970_v2, %s3928_s24 }
  0x1c   :  { %494 = vrot.lane.b32.xlu1 %v3983_v6, %s3929_s25  ;;  %492 = vrot.lane.b32.xlu0 %v3972_v3, %s3929_s25 }
  0x20   :  { %498 = vrot.lane.b32.xlu1 %v3981_v5, %s3929_s25  ;;  %496 = vrot.lane.b32.xlu0 %v3970_v2, %s3929_s25 }
  0x24   :  { %737 = vrot.lane.b32.xlu0 %v3972_v3, %s3930_s26  ;;  %739 = vrot.lane.b32.xlu1 %v3983_v6, %s3930_s26 }
  0x28   :  { %741 = vrot.lane.b32.xlu0 %v3970_v2, %s3930_s26  ;;  %743 = vrot.lane.b32.xlu1 %v3981_v5, %s3930_s26 }
  0x2c   :  { %879 = vrot.lane.b32.xlu0 %v3972_v3, %s3931_s27  ;;  %881 = vrot.lane.b32.xlu1 %v3983_v6, %s3931_s27 }
  0x30   :  { %883 = vrot.lane.b32.xlu0 %v3970_v2, %s3931_s27  ;;  %885 = vrot.lane.b32.xlu1 %v3981_v5, %s3931_s27 }
  0x34   :  { %1021 = vrot.lane.b32.xlu0 %v3972_v3, %s3932_s28  ;;  %1023 = vrot.lane.b32.xlu1 %v3983_v6, %s3932_s28 }
  0x38   :  { %1025 = vrot.lane.b32.xlu0 %v3970_v2, %s3932_s28  ;;  %1027 = vrot.lane.b32.xlu1 %v3981_v5, %s3932_s28 }
  0x3c   :  { %1163 = vrot.lane.b32.xlu0 %v3972_v3, %s3933_s29  ;;  %1165 = vrot.lane.b32.xlu1 %v3983_v6, %s3933_s29 }
  0x40   :  { %1167 = vrot.lane.b32.xlu0 %v3970_v2, %s3933_s29  ;;  %1169 = vrot.lane.b32.xlu1 %v3981_v5, %s3933_s29 }
  0x76   :  { %v106_v24 = vpop.permute.xlu1 %105  ;;  %v102_v25 = vpop.permute.xlu0 %101 }
  0x77   :  { %v118_v28 = vsel %vm109_vm0, 0, %v102_v25 }
  0x78   :  { %v148_v36 = vmul.bf16 %v4066_v27, %v118_v28 }
  0x7a   :  { %v108_v33 = vpop.permute.xlu1 %107  ;;  %v104_v34 = vpop.permute.xlu0 %103  ;;  %v160_v48 = vsel %vm158_vm1, %v148_v36, 0 }
  0x7b   :  { %v112_v38 = vsel %vm109_vm0, %v106_v24, %v108_v33  ;;  %v110_v39 = vsel %vm109_vm0, %v102_v25, %v104_v34  ;;  %v111_v40 = vsel %vm109_vm0, %v104_v34, %v106_v24  ;;  %v4153_v34 = vrot.slane %v4055_v20, %v371_v53 }
  0x7c   :  { %v151_v42 = vmul.bf16 %v4070_v29, %v112_v38  ;;  %v149_v43 = vmul.bf16 %v4073_v30, %v110_v39  ;;  %v150_v45 = vmul.bf16 %v4078_v32, %v111_v40  ;;  %v4159_v39 = vrot.slane %v4059_v22, %v371_v53 }
  0x7e   :  { %3725 = vmatprep.subr.msk.bf16.mxu1 %vm158_vm1, %v151_v42  ;;  %v41_v46 = vpop.permute.xlu1 %40  ;;  %3723 = vmatprep.subr.msk.bf16.mxu0 %vm158_vm1, %v149_v43  ;;  %v39_v47 = vpop.permute.xlu0 %38  ;;  %v166_v49 = vsel %vm158_vm1, %v150_v45, 0 }
  0x7f   :  { %v47_v50 = vsel %vm46_vm2, %v39_v47, %v41_v46  ;;  %v56_v51 = vsel %vm46_vm2, 0, %v39_v47  ;;  %186 = vmatpush1.bf16.msra.mxu0 %v160_v48  ;;  %227 = vmatpush1.bf16.msra.mxu1 %v166_v49  ;;  %v3731_v47 = vld [vmem:[%s4867_s2 + $0x8] sm:$0xf] }
  0x80   :  { %v96_v54 = vmul.bf16 %v4081_v35, %v56_v51  ;;  %v97_v55 = vmul.bf16 %v4094_v44, %v47_v50  ;;  %v4172_v50 = vrot.slane %v4061_v23, %v371_v53  ;;  %v4175_v51 = vrot.slane %v4057_v21, %v371_v53 }
  0x82   :  { %v45_v58 = vpop.permute.xlu1 %44  ;;  %3724 = vmatmul.mubr.msk.bf16.vlgmr.msra.gmra.mxu0 %vm154_vm3, %v3722_v52  ;;  %3726 = vmatmul.mubr.msk.bf16.vlgmr.msra.gmra.mxu1 %vm154_vm3, %v3722_v52  ;;  %v43_v59 = vpop.permute.xlu0 %42  ;;  %v257_v60 = vsel %vm158_vm1, %v96_v54, 0 }
  0x83   :  { %v48_v61 = vsel %vm46_vm2, %v41_v46, %v43_v59  ;;  %v49_v62 = vsel %vm46_vm2, %v43_v59, %v45_v58  ;;  %3727 = vmatprep.subr.msk.bf16.mxu0 %vm158_vm1, %v97_v55  ;;  %300 = vmatprep.mubr.bf16.mxu0 %v4871_v4 }
  0x84   :  { %v98_v0 = vmul.bf16 %v4110_v56, %v48_v61  ;;  %v99_v1 = vmul.bf16 %v4113_v57, %v49_v62  ;;  %283 = vmatpush1.bf16.msra.mxu0 %v257_v60  ;;  %341 = vmatprep.mubr.bf16.mxu1 %v4871_v4  ;;  %v758_v60 = vsub.s32 2, %v4052_v14 }
  0x86   :  { %v353_v8 = vpop.permute.xlu1 %352  ;;  %3729 = vmatprep.subr.msk.bf16.mxu1 %vm158_vm1, %v99_v1  ;;  %v351_v9 = vpop.permute.xlu0 %350  ;;  %v263_v10 = vsel %vm158_vm1, %v98_v0, 0 }
  0x87   :  { %v359_v11 = vsel %vm358_vm4, %v351_v9, %v353_v8  ;;  %v367_v12 = vsel %vm358_vm4, 0, %v351_v9  ;;  %324 = vmatpush1.bf16.msra.mxu1 %v263_v10  ;;  %v4196_v9 = vrot.slane %v4063_v26, %v758_v60  ;;  %v4199_v10 = vrot.slane %v4075_v31, %v758_v60 }
  0x88   :  { %v385_v15 = vmul.bf16 %v4122_v63, %v367_v12  ;;  %v386_v16 = vmul.bf16 %v4128_v7, %v359_v11  ;;  %v646_v12 = vsel %vm158_vm1, %v3970_v2, 0 }
  0x89   :  { %4909 = vst [vmem:[#allocation2_spill] sm:$0xff] %v4196_v9  ;;  %4910 = vst [vmem:[#allocation3_spill] sm:$0xff] %v4199_v10 }
  0x8a   :  { %v357_v19 = vpop.permute.xlu1 %356  ;;  %3728 = vmatmul.mubr.msk.bf16.vlgmr.msra.gmra.mxu0 %vm154_vm3, %v100_v13  ;;  %3730 = vmatmul.mubr.msk.bf16.vlgmr.msra.gmra.mxu1 %vm154_vm3, %v100_v13  ;;  %v355_v24 = vpop.permute.xlu0 %354  ;;  %v395_v25 = vsel %vm158_vm1, %v385_v15, 0  ;;  %v4209_v13 = vrot.slane %v4084_v37, %v758_v60  ;;  %v4212_v15 = vrot.slane %v4089_v41, %v758_v60 }
  0x8b   :  { %v360_v28 = vsel %vm358_vm4, %v353_v8, %v355_v24  ;;  %v361_v33 = vsel %vm358_vm4, %v355_v24, %v357_v19  ;;  %3732 = vmatprep.subr.msk.bf16.mxu0 %vm158_vm1, %v386_v16  ;;  %438 = vmatprep.mubr.bf16.mxu0 %v4871_v4  ;;  %v3736_v8 = vld [vmem:[%s4867_s2 + $0xc] sm:$0xf] }
  0x8c   :  { %v387_v36 = vmul.bf16 %v4141_v17, %v360_v28  ;;  %v388_v38 = vmul.bf16 %v4144_v18, %v361_v33  ;;  %421 = vmatpush1.bf16.msra.mxu0 %v395_v25  ;;  %479 = vmatprep.mubr.bf16.mxu1 %v4871_v4  ;;  %4911 = vst [vmem:[#allocation4_spill] sm:$0xff] %v4209_v13  ;;  %4912 = vst [vmem:[#allocation5_spill] sm:$0xff] %v4212_v15 }
  0x8e   :  { %v495_v40 = vpop.permute.xlu1 %494  ;;  %3734 = vmatprep.subr.msk.bf16.mxu1 %vm158_vm1, %v388_v38  ;;  %v493_v42 = vpop.permute.xlu0 %492  ;;  %v401_v43 = vsel %vm158_vm1, %v387_v36, 0 }
  0x8f   :  { %v501_v45 = vsel %vm500_vm5, %v493_v42, %v495_v40  ;;  %v509_v46 = vsel %vm500_vm5, 0, %v493_v42  ;;  %462 = vmatpush1.bf16.msra.mxu1 %v401_v43  ;;  %v4231_v42 = vrot.slane %v4055_v20, %v758_v60  ;;  %v4234_v43 = vrot.slane %v4059_v22, %v758_v60 }
  0x90   :  { %v527_v48 = vmul.bf16 %v4153_v34, %v509_v46  ;;  %v528_v49 = vmul.bf16 %v4159_v39, %v501_v45  ;;  %v4237_v45 = vrot.slane %v4061_v23, %v758_v60 }
  0x91   :  { %4913 = vst [vmem:[#allocation6_spill] sm:$0xff] %v4231_v42  ;;  %4914 = vst [vmem:[#allocation7_spill] sm:$0xff] %v4234_v43 }
  0x92   :  { %v499_v52 = vpop.permute.xlu1 %498  ;;  %3733 = vmatmul.mubr.msk.bf16.vlgmr.msra.gmra.mxu0 %vm154_vm3, %v3731_v47  ;;  %3735 = vmatmul.mubr.msk.bf16.vlgmr.msra.gmra.mxu1 %vm154_vm3, %v3731_v47  ;;  %v497_v54 = vpop.permute.xlu0 %496  ;;  %v537_v55 = vsel %vm158_vm1, %v527_v48, 0  ;;  %4915 = vst [vmem:[#allocation8_spill] sm:$0xff] %v4237_v45 }
  0x93   :  { %v502_v58 = vsel %vm500_vm5, %v495_v40, %v497_v54  ;;  %v503_v59 = vsel %vm500_vm5, %v497_v54, %v499_v52  ;;  %3737 = vmatprep.subr.msk.bf16.mxu0 %vm158_vm1, %v528_v49  ;;  %580 = vmatprep.mubr.bf16.mxu0 %v4871_v4  ;;  %v3741_v40 = vld [vmem:[%s4867_s2 + $0x10] sm:$0xf]  ;;  %v4243_v49 = vrot.slane %v4057_v21, %v758_v60 }
  0x94   :  { %v529_v53 = vmul.bf16 %v4172_v50, %v502_v58  ;;  %v530_v61 = vmul.bf16 %v4175_v51, %v503_v59  ;;  %563 = vmatpush1.bf16.msra.mxu0 %v537_v55  ;;  %621 = vmatprep.mubr.bf16.mxu1 %v4871_v4  ;;  %v1042_v55 = vsub.s32 3, %v4052_v14 }
  0x95   :  { %3742 = vmatprep.subr.msk.bf16.mxu0 %vm158_vm1, %v3983_v6  ;;  %v640_v6 = vsel %vm158_vm1, %v3972_v3, 0  ;;  %4916 = vst [vmem:[#allocation9_spill] sm:$0xff] %v4243_v49 }
  0x96   :  { %3739 = vmatprep.subr.msk.bf16.mxu1 %vm158_vm1, %v530_v61  ;;  %v543_v62 = vsel %vm158_vm1, %v529_v53, 0  ;;  %v738_v0 = vpop.permute.xlu0 %737  ;;  %v740_v1 = vpop.permute.xlu1 %739 }
  0x97   :  { %604 = vmatpush1.bf16.msra.mxu1 %v543_v62  ;;  %v746_v11 = vsel %vm745_vm6, %v738_v0, %v740_v1 }
  0x98   :  { %3744 = vmatprep.subr.msk.bf16.mxu1 %vm158_vm1, %v3981_v5  ;;  %v772_v19 = vmul.bf16 %v4196_v9, %v746_v11  ;;  %v4266_v11 = vrot.slane %v4075_v31, %v1042_v55 }
  0x9a   :  { %3738 = vmatmul.mubr.msk.bf16.vlgmr.msra.gmra.mxu0 %vm154_vm3, %v3736_v8  ;;  %3740 = vmatmul.mubr.msk.bf16.vlgmr.msra.gmra.mxu1 %vm154_vm3, %v3736_v8  ;;  %v742_v16 = vpop.permute.xlu0 %741  ;;  %v744_v3 = vpop.permute.xlu1 %743  ;;  %v782_v46 = vsel %vm158_vm1, %v772_v19, 0  ;;  %v3746_v8 = vld [vmem:[%s4867_s2 + $0x14] sm:$0xf]  ;;  %4918 = vst [vmem:[#allocation11_spill] sm:$0xff] %v4266_v11 }
  0x9b   :  { %v747_v24 = vsel %vm745_vm6, %v740_v1, %v742_v16  ;;  %666 = vmatpush1.bf16.msra.mxu0 %v640_v6  ;;  %707 = vmatpush1.bf16.msra.mxu1 %v646_v12  ;;  %v748_v2 = vsel %vm745_vm6, %v742_v16, %v744_v3  ;;  %v754_v5 = vsel %vm745_vm6, %v744_v3, 0  ;;  %v4263_v6 = vrot.slane %v4063_v26, %v1042_v55 }
  0x9c   :  { %v773_v25 = vmul.bf16 %v4199_v10, %v747_v24  ;;  %683 = vmatprep.mubr.bf16.mxu0 %v4871_v4  ;;  %724 = vmatprep.mubr.bf16.mxu1 %v4871_v4  ;;  %v774_v28 = vmul.bf16 %v4209_v13, %v748_v2  ;;  %v775_v33 = vmul.bf16 %v4212_v15, %v754_v5 }
  0x9d   :  { %4917 = vst [vmem:[#allocation10_spill] sm:$0xff] %v4263_v6  ;;  %v4269_v12 = vrot.slane %v4084_v37, %v1042_v55  ;;  %v4275_v24 = vrot.slane %v4089_v41, %v1042_v55 }
  0x9e   :  { %v880_v36 = vpop.permute.xlu0 %879  ;;  %3747 = vmatprep.subr.msk.bf16.mxu0 %vm158_vm1, %v773_v25  ;;  %v882_v38 = vpop.permute.xlu1 %881  ;;  %3749 = vmatprep.subr.msk.bf16.mxu1 %vm158_vm1, %v775_v33  ;;  %v788_v48 = vsel %vm158_vm1, %v774_v28, 0 }
  0x9f   :  { %v888_v47 = vsel %vm887_vm7, %v880_v36, %v882_v38  ;;  %4919 = vst [vmem:[#allocation12_spill] sm:$0xff] %v4269_v12  ;;  %4920 = vst [vmem:[#allocation13_spill] sm:$0xff] %v4275_v24 }
  0xa0   :  { %v914_v58 = vmul.bf16 %v4231_v42, %v888_v47  ;;  %v4297_v47 = vrot.slane %v4059_v22, %v1042_v55 }
  0xa2   :  { %3745 = vmatmul.mubr.msk.bf16.vlgmr.msra.gmra.mxu1 %vm154_vm3, %v3741_v40  ;;  %3743 = vmatmul.mubr.msk.bf16.vlgmr.msra.gmra.mxu0 %vm154_vm3, %v3741_v40  ;;  %v884_v52 = vpop.permute.xlu0 %883  ;;  %v886_v54 = vpop.permute.xlu1 %885  ;;  %v924_v16 = vsel %vm158_vm1, %v914_v58, 0  ;;  %v3751_v40 = vld [vmem:[%s4867_s2 + $0x18] sm:$0xf]  ;;  %4922 = vst [vmem:[#allocation15_spill] sm:$0xff] %v4297_v47 }
  0xa3   :  { %808 = vmatpush1.bf16.msra.mxu0 %v782_v46  ;;  %v889_v59 = vsel %vm887_vm7, %v882_v38, %v884_v52  ;;  %849 = vmatpush1.bf16.msra.mxu1 %v788_v48  ;;  %v890_v53 = vsel %vm887_vm7, %v884_v52, %v886_v54  ;;  %v896_v61 = vsel %vm887_vm7, %v886_v54, 0  ;;  %v4294_v46 = vrot.slane %v4055_v20, %v1042_v55 }
  0xa4   :  { %v915_v60 = vmul.bf16 %v4234_v43, %v889_v59  ;;  %825 = vmatprep.mubr.bf16.mxu0 %v4871_v4  ;;  %866 = vmatprep.mubr.bf16.mxu1 %v4871_v4  ;;  %v916_v62 = vmul.bf16 %v4237_v45, %v890_v53  ;;  %v917_v14 = vmul.bf16 %v4243_v49, %v896_v61 }
  0xa5   :  { %4921 = vst [vmem:[#allocation14_spill] sm:$0xff] %v4294_v46  ;;  %v4300_v48 = vrot.slane %v4061_v23, %v1042_v55  ;;  %v4306_v59 = vrot.slane %v4057_v21, %v1042_v55 }
  0xa6   :  { %v1022_v0 = vpop.permute.xlu0 %1021  ;;  %3752 = vmatprep.subr.msk.bf16.mxu0 %vm158_vm1, %v915_v60  ;;  %v1024_v1 = vpop.permute.xlu1 %1023  ;;  %3754 = vmatprep.subr.msk.bf16.mxu1 %vm158_vm1, %v917_v14  ;;  %v930_v19 = vsel %vm158_vm1, %v916_v62, 0  ;;  %v3756_v14 = vld [vmem:[%s4867_s2 + $0x1c] sm:$0xf] }
  0xa7   :  { %v1030_v3 = vsel %vm1029_vm8, %v1022_v0, %v1024_v1  ;;  %4923 = vst [vmem:[#allocation16_spill] sm:$0xff] %v4300_v48  ;;  %4924 = vst [vmem:[#allocation17_spill] sm:$0xff] %v4306_v59 }
  0xa8   :  { %v1056_v31 = vmul.bf16 %v4263_v6, %v1030_v3 }
  0xaa   :  { %3750 = vmatmul.mubr.msk.bf16.vlgmr.msra.gmra.mxu1 %vm154_vm3, %v3746_v8  ;;  %3748 = vmatmul.mubr.msk.bf16.vlgmr.msra.gmra.mxu0 %vm154_vm3, %v3746_v8  ;;  %v1026_v26 = vpop.permute.xlu0 %1025  ;;  %v1028_v2 = vpop.permute.xlu1 %1027  ;;  %v1066_v52 = vsel %vm158_vm1, %v1056_v31, 0  ;;  %v3761_v8 = vld [vmem:[%s4867_s2 + $0x20] sm:$0xf] }
  0xab   :  { %950 = vmatpush1.bf16.msra.mxu0 %v924_v16  ;;  %v1031_v37 = vsel %vm1029_vm8, %v1024_v1, %v1026_v26  ;;  %991 = vmatpush1.bf16.msra.mxu1 %v930_v19  ;;  %v1032_v5 = vsel %vm1029_vm8, %v1026_v26, %v1028_v2  ;;  %v1038_v25 = vsel %vm1029_vm8, %v1028_v2, 0  ;;  %v1313_v16 = vld [vmem:[%s4868_s4] sm:$0xff] }
  0xac   :  { %v1057_v28 = vmul.bf16 %v4266_v11, %v1031_v37  ;;  %967 = vmatprep.mubr.bf16.mxu0 %v4871_v4  ;;  %1008 = vmatprep.mubr.bf16.mxu1 %v4871_v4  ;;  %v1058_v41 = vmul.bf16 %v4269_v12, %v1032_v5  ;;  %v1059_v33 = vmul.bf16 %v4275_v24, %v1038_v25 }
  0xad   :  { %1316 = vperm.xlu0 %3883, %v1313_v16  }
  0xae   :  { %v1164_v36 = vpop.permute.xlu0 %1163  ;;  %3757 = vmatprep.subr.msk.bf16.mxu0 %vm158_vm1, %v1057_v28  ;;  %v1166_v38 = vpop.permute.xlu1 %1165  ;;  %3759 = vmatprep.subr.msk.bf16.mxu1 %vm158_vm1, %v1059_v33  ;;  %v1072_v58 = vsel %vm158_vm1, %v1058_v41, 0 }
  0xaf   :  { %v1172_v54 = vsel %vm1171_vm9, %v1164_v36, %v1166_v38 }
  0xb0   :  { %v1198_v22 = vmul.bf16 %v4294_v46, %v1172_v54 }
  0xb2   :  { %3755 = vmatmul.mubr.msk.bf16.vlgmr.msra.gmra.mxu1 %vm154_vm3, %v3751_v40  ;;  %3753 = vmatmul.mubr.msk.bf16.vlgmr.msra.gmra.mxu0 %vm154_vm3, %v3751_v40  ;;  %v1168_v20 = vpop.permute.xlu0 %1167  ;;  %v1170_v53 = vpop.permute.xlu1 %1169  ;;  %v1208_v0 = vsel %vm158_vm1, %v1198_v22, 0 }
  0xb3   :  { %1092 = vmatpush1.bf16.msra.mxu0 %v1066_v52  ;;  %v1173_v23 = vsel %vm1171_vm9, %v1166_v38, %v1168_v20  ;;  %1133 = vmatpush1.bf16.msra.mxu1 %v1072_v58  ;;  %v1174_v61 = vsel %vm1171_vm9, %v1168_v20, %v1170_v53  ;;  %v1180_v60 = vsel %vm1171_vm9, %v1170_v53, 0 }
  0xb4   :  { %v1199_v62 = vmul.bf16 %v4297_v47, %v1173_v23  ;;  %1109 = vmatprep.mubr.bf16.mxu0 %v4871_v4  ;;  %1150 = vmatprep.mubr.bf16.mxu1 %v4871_v4  ;;  %v1200_v21 = vmul.bf16 %v4300_v48, %v1174_v61  ;;  %v1201_v55 = vmul.bf16 %v4306_v59, %v1180_v60 }
  0xb6   :  { %3762 = vmatprep.subr.msk.bf16.mxu0 %vm158_vm1, %v1199_v62  ;;  %3764 = vmatprep.subr.msk.bf16.mxu1 %vm158_vm1, %v1201_v55  ;;  %v1214_v1 = vsel %vm158_vm1, %v1200_v21, 0 }
  0xba   :  { %3758 = vmatmul.mubr.msk.bf16.vlgmr.msra.gmra.mxu0 %vm154_vm3, %v3756_v14  ;;  %3760 = vmatmul.mubr.msk.bf16.vlgmr.msra.gmra.mxu1 %vm154_vm3, %v3756_v14 }
  0xbb   :  { %1234 = vmatpush1.bf16.msra.mxu0 %v1208_v0  ;;  %1275 = vmatpush1.bf16.msra.mxu1 %v1214_v1 }
  0xbc   :  { %1251 = vmatprep.mubr.bf16.mxu0 %v4871_v4  ;;  %1292 = vmatprep.mubr.bf16.mxu1 %v4871_v4 }
  0xc2   :  { %3763 = vmatmul.mubr.msk.bf16.vlgmr.msra.gmra.mxu0 %vm154_vm3, %v3761_v8  ;;  %3765 = vmatmul.mubr.msk.bf16.vlgmr.msra.gmra.mxu1 %vm154_vm3, %v3761_v8 }
  0xc3   :  { %1366 = vmatprep.mubr.bf16.mxu0 %v4871_v4  ;;  %1407 = vmatprep.mubr.bf16.mxu1 %v4871_v4 }
 0x142   :  { %v205_v3 = vpop.f32.mrf.mxu0  ;;  %v246_v19 = vpop.f32.mrf.mxu1 }
 0x144   :  { %v207_v26 = vpop.f32.mrf.mxu0  ;;  %v248_v2 = vpop.f32.mrf.mxu1 }
 0x146   :  { %v209_v31 = vpop.f32.mrf.mxu0  ;;  %v250_v37 = vpop.f32.mrf.mxu1 }
 0x148   :  { %v210_v5 = vpop.f32.mrf.mxu0  ;;  %v251_v25 = vpop.f32.mrf.mxu1 }
 0x14a   :  { %v302_v28 = vpop.f32.mrf.mxu0  ;;  %v343_v41 = vpop.f32.mrf.mxu1 }
 0x14b   :  { %v303_v12 = vadd.f32 %v302_v28, %v205_v3  ;;  %v344_v24 = vadd.f32 %v343_v41, %v246_v19 }
 0x14c   :  { %v304_v33 = vpop.f32.mrf.mxu0  ;;  %v345_v36 = vpop.f32.mrf.mxu1 }
 0x14e   :  { %v306_v38 = vpop.f32.mrf.mxu0  ;;  %v347_v40 = vpop.f32.mrf.mxu1 }
 0x150   :  { %v307_v52 = vpop.f32.mrf.mxu0  ;;  %v348_v54 = vpop.f32.mrf.mxu1 }
 0x152   :  { %v440_v58 = vpop.f32.mrf.mxu0  ;;  %v481_v20 = vpop.f32.mrf.mxu1 }
 0x154   :  { %v442_v53 = vpop.f32.mrf.mxu0  ;;  %v483_v22 = vpop.f32.mrf.mxu1 }
 0x156   :  { %v444_v23 = vpop.f32.mrf.mxu0  ;;  %v485_v61 = vpop.f32.mrf.mxu1 }
 0x158   :  { %v445_v60 = vpop.f32.mrf.mxu0  ;;  %v486_v62 = vpop.f32.mrf.mxu1 }
 0x15a   :  { %v582_v21 = vpop.f32.mrf.mxu0  ;;  %v623_v55 = vpop.f32.mrf.mxu1 }
 0x15c   :  { %v584_v14 = vpop.f32.mrf.mxu0  ;;  %v625_v0 = vpop.f32.mrf.mxu1 }
 0x15e   :  { %v586_v1 = vpop.f32.mrf.mxu0  ;;  %v627_v8 = vpop.f32.mrf.mxu1 }
 0x160   :  { %v587_v16 = vpop.f32.mrf.mxu0  ;;  %v628_v31 = vpop.f32.mrf.mxu1 }
 0x162   :  { %v685_v37 = vpop.f32.mrf.mxu0  ;;  %v726_v5 = vpop.f32.mrf.mxu1 }
 0x164   :  { %v687_v25 = vpop.f32.mrf.mxu0  ;;  %v728_v38 = vpop.f32.mrf.mxu1 }
 0x166   :  { %v689_v40 = vpop.f32.mrf.mxu0  ;;  %v730_v52 = vpop.f32.mrf.mxu1 }
 0x167   :  { %v305_v40 = vadd.f32 %v304_v33, %v207_v26  ;;  %v346_v52 = vadd.f32 %v345_v36, %v248_v2 }
 0x168   :  { %v690_v54 = vpop.f32.mrf.mxu0  ;;  %v731_v4 = vpop.f32.mrf.mxu1 }
 0x169   :  { %v488_v54 = vadd.f32 %v440_v58, %v303_v12  ;;  %v490_v4 = vadd.f32 %v481_v20, %v344_v24  ;;  %v489_v42 = vadd.f32 %v442_v53, %v305_v40  ;;  %v491_v43 = vadd.f32 %v483_v22, %v346_v52 }
 0x16a   :  { %v827_v23 = vpop.f32.mrf.mxu0  ;;  %v868_v61 = vpop.f32.mrf.mxu1 }
 0x16b   :  { %v631_v13 = vadd.f32 %v584_v14, %v489_v42  ;;  %v633_v15 = vadd.f32 %v625_v0, %v491_v43 }
 0x16c   :  { %v829_v60 = vpop.f32.mrf.mxu0  ;;  %v870_v62 = vpop.f32.mrf.mxu1 }
 0x16e   :  { %v831_v48 = vpop.f32.mrf.mxu0  ;;  %v872_v59 = vpop.f32.mrf.mxu1 }
 0x16f   :  { %v630_v48 = vadd.f32 %v582_v21, %v488_v54  ;;  %v632_v59 = vadd.f32 %v623_v55, %v490_v4  ;;  %v27_v54 = vld [vmem:[%s4869_s3] sm:$0xf]  ;;  %v4925_v4 = vmov 0  }
 0x170   :  { %v832_v46 = vpop.f32.mrf.mxu0  ;;  %v873_v47 = vpop.f32.mrf.mxu1 }
 0x171   :  { %v733_v9 = vadd.f32 %v685_v37, %v630_v48  ;;  %v735_v10 = vadd.f32 %v726_v5, %v632_v59  ;;  %v1317_v48 = vpop.permute.xlu0 %1316 }
 0x172   :  { %v969_v1 = vpop.f32.mrf.mxu0  ;;  %v1010_v8 = vpop.f32.mrf.mxu1 }
 0x173   :  { %v875_v26 = vadd.f32 %v827_v23, %v733_v9  ;;  %v877_v2 = vadd.f32 %v868_v61, %v735_v10 }
 0x174   :  { %v971_v16 = vpop.f32.mrf.mxu0  ;;  %v1012_v31 = vpop.f32.mrf.mxu1 }
 0x175   :  { %v1017_v28 = vadd.f32 %v969_v1, %v875_v26  ;;  %v1019_v41 = vadd.f32 %v1010_v8, %v877_v2 }
 0x176   :  { %v973_v6 = vpop.f32.mrf.mxu0  ;;  %v1014_v11 = vpop.f32.mrf.mxu1 }
 0x177   :  { %v734_v6 = vadd.f32 %v687_v25, %v631_v13  ;;  %v736_v11 = vadd.f32 %v728_v38, %v633_v15 }
 0x178   :  { %v974_v45 = vpop.f32.mrf.mxu0  ;;  %v1015_v49 = vpop.f32.mrf.mxu1 }
 0x179   :  { %v876_v45 = vadd.f32 %v829_v60, %v734_v6  ;;  %v878_v49 = vadd.f32 %v870_v62, %v736_v11 }
 0x17a   :  { %v1111_v46 = vpop.f32.mrf.mxu0  ;;  %v1152_v47 = vpop.f32.mrf.mxu1 }
 0x17b   :  { %v1018_v58 = vadd.f32 %v971_v16, %v876_v45  ;;  %v1020_v20 = vadd.f32 %v1012_v31, %v878_v49  ;;  %v1159_v42 = vadd.f32 %v1111_v46, %v1017_v28  ;;  %v1161_v43 = vadd.f32 %v1152_v47, %v1019_v41 }
 0x17c   :  { %v1113_v3 = vpop.f32.mrf.mxu0  ;;  %v1154_v19 = vpop.f32.mrf.mxu1 }
 0x17d   :  { %v1160_v21 = vadd.f32 %v1113_v3, %v1018_v58  ;;  %v1162_v55 = vadd.f32 %v1154_v19, %v1020_v20 }
 0x17e   :  { %v1115_v12 = vpop.f32.mrf.mxu0  ;;  %v1156_v24 = vpop.f32.mrf.mxu1 }
 0x180   :  { %v1116_v33 = vpop.f32.mrf.mxu0  ;;  %v1157_v36 = vpop.f32.mrf.mxu1 }
 0x182   :  { %v1253_v53 = vpop.f32.mrf.mxu0  ;;  %v1294_v22 = vpop.f32.mrf.mxu1 }
 0x183   :  { %v1301_v13 = vadd.f32 %v1253_v53, %v1159_v42  ;;  %v1303_v15 = vadd.f32 %v1294_v22, %v1161_v43 }
 0x184   :  { %v1255_v9 = vpop.f32.mrf.mxu0  ;;  %v1296_v10 = vpop.f32.mrf.mxu1 }
 0x185   :  { %v1305_v14 = vmax.f32 %v1301_v13, 0.0  ;;  %v1307_v0 = vmax.f32 %v1303_v15, 0.0  ;;  %v1302_v37 = vadd.f32 %v1255_v9, %v1160_v21  ;;  %v1304_v5 = vadd.f32 %v1296_v10, %v1162_v55  ;;  %v22_v55 = vld [vmem:[%s4865_s0 + $0x8] sm:$0xff]  ;;  %v21_v13 = vld [vmem:[%s4865_s0] sm:$0xff] }
 0x186   :  { %v1257_v25 = vpop.f32.mrf.mxu0  ;;  %v1298_v38 = vpop.f32.mrf.mxu1  ;;  %v1442_v15 = vunpack.c.l.bf16 %v22_v55  ;;  %v1440_v9 = vunpack.c.l.bf16 %v21_v13 }
 0x187   :  { %v1309_v23 = vpack.c.bf16 %v1305_v14, %v1305_v14  ;;  %v1311_v61 = vpack.c.bf16 %v1307_v0, %v1307_v0  ;;  %v1306_v60 = vmax.f32 %v1302_v37, 0.0  ;;  %v1308_v62 = vmax.f32 %v1304_v5, 0.0 }
 0x188   :  { %v1258_v1 = vpop.f32.mrf.mxu0  ;;  %v1299_v8 = vpop.f32.mrf.mxu1  ;;  %v1441_v14 = vunpack.c.h.bf16 %v21_v13 }
 0x189   :  { %v1310_v16 = vpack.c.bf16 %v1306_v60, %v1306_v60  ;;  %v1312_v31 = vpack.c.bf16 %v1308_v62, %v1308_v62  ;;  %v1323_v40 = vsel %vm158_vm1, %v1309_v23, 0  ;;  %v1329_v52 = vsel %vm158_vm1, %v1311_v61, 0 }
 0x18a   :  { %v1443_v60 = vunpack.c.h.bf16 %v22_v55 }
 0x18b   :  { %3766 = vmatprep.subr.msk.bf16.mxu0 %vm158_vm1, %v1310_v16  ;;  %3768 = vmatprep.subr.msk.bf16.mxu1 %vm158_vm1, %v1312_v31  ;;  %v3819_v31 = vld [vmem:[%s4868_s4 + $0x8] sm:$0xff] }
 0x18c   :  { %1349 = vmatpush1.bf16.msra.mxu0 %v1323_v40  ;;  %1390 = vmatpush1.bf16.msra.mxu1 %v1329_v52 }
 0x18f   :  { %3767 = vmatmul.mubr.msk.bf16.vlgmr.msra.gmra.mxu0 %vm154_vm3, %v27_v54  ;;  %3769 = vmatmul.mubr.msk.bf16.vlgmr.msra.gmra.mxu1 %vm154_vm3, %v27_v54 }
 0x190   :  { %1549 = vmatprep.mubr.bf16.mxu0 %v4925_v4  ;;  %1590 = vmatprep.mubr.bf16.mxu1 %v4925_v4 }
 0x24f   :  { %v1409_v59 = vpop.f32.mrf.mxu1  ;;  %v1368_v46 = vpop.f32.mrf.mxu0 }
 0x250   :  { %v1410_v47 = vadd.f32 %v1409_v59, %v1317_v48  ;;  %v1369_v3 = vadd.f32 %v1368_v46, %v1317_v48 }
 0x251   :  { %v1370_v19 = vpop.f32.mrf.mxu0  ;;  %v1411_v6 = vpop.f32.mrf.mxu1 }
 0x252   :  { %v3772_v11 = vmul.f32 -1.442695, %v1410_v47  ;;  %v3770_v26 = vmul.f32 -1.442695, %v1369_v3  ;;  %v1371_v2 = vadd.f32 %v1370_v19, %v1317_v48  ;;  %v1412_v12 = vadd.f32 %v1411_v6, %v1317_v48 }
 0x253   :  { %v1372_v24 = vpop.f32.mrf.mxu0  ;;  %v1413_v45 = vpop.f32.mrf.mxu1 }
 0x254   :  { %3893 = vpow2.f32 %v3772_v11  ;;  %v3771_v49 = vmul.f32 -1.442695, %v1371_v2  ;;  %v3773_v28 = vmul.f32 -1.442695, %v1412_v12  ;;  %v3775_v45 = vld [vmem:[%s4867_s2 + $0x28] sm:$0xf] }
 0x255   :  { %3895 = vpow2.f32 %v3770_v26  ;;  %v1373_v41 = vpop.f32.mrf.mxu0  ;;  %v1414_v33 = vpop.f32.mrf.mxu1 }
 0x256   :  { %3897 = vpow2.f32 %v3771_v49 }
 0x257   :  { %3899 = vpow2.f32 %v3773_v28 }
 0x261   :  { %v3894_v36 = vpop.eup %3893 }
 0x262   :  { %v3896_v58 = vpop.eup %3895  ;;  %v1430_v20 = vadd.f32 1.0, %v3894_v36 }
 0x263   :  { %v3898_v42 = vpop.eup %3897  ;;  %v1428_v43 = vadd.f32 1.0, %v3896_v58 }
 0x264   :  { %v3900_v53 = vpop.eup %3899  ;;  %3901 = vrcp.f32 %v1430_v20  ;;  %v1429_v22 = vadd.f32 1.0, %v3898_v42 }
 0x265   :  { %3903 = vrcp.f32 %v1428_v43  ;;  %v1431_v21 = vadd.f32 1.0, %v3900_v53 }
 0x266   :  { %3905 = vrcp.f32 %v1429_v22 }
 0x267   :  { %3907 = vrcp.f32 %v1431_v21 }
 0x271   :  { %v3902_v10 = vpop.eup %3901 }
 0x272   :  { %v3904_v0 = vpop.eup %3903  ;;  %v4357_v37 = vmul.f32 %v3902_v10, %v1442_v15  ;;  %v3774_v15 = vld [vmem:[%s4867_s2 + $0x24] sm:$0xf] }
 0x273   :  { %v3906_v5 = vpop.eup %3905  ;;  %v4359_v25 = vmul.f32 %v3904_v0, %v1440_v9 }
 0x274   :  { %4926 = vst [vmem:[#allocation18_spill] sm:$0xff] %v4357_v37  ;;  %v4363_v38 = vpack.c.bf16 %v4357_v37, %v4357_v37  ;;  %v4369_v61 = vmul.f32 %v3906_v5, %v1441_v14  ;;  %v3908_v62 = vpop.eup %3907 }
 0x275   :  { %4927 = vst [vmem:[#allocation19_spill] sm:$0xff] %v4359_v25  ;;  %v4367_v23 = vpack.c.bf16 %v4359_v25, %v4359_v25  ;;  %v4379_v8 = vmul.f32 %v3908_v62, %v1443_v60 }
 0x276   :  { %4928 = vst [vmem:[#allocation20_spill] sm:$0xff] %v4369_v61  ;;  %1483 = vrot.lane.b32.xlu0 %v4363_v38, %s3926_s22  ;;  %v4377_v1 = vpack.c.bf16 %v4369_v61, %v4369_v61 }
 0x277   :  { %1479 = vrot.lane.b32.xlu1 %v4367_v23, %s3926_s22  ;;  %4929 = vst [vmem:[#allocation21_spill] sm:$0xff] %v4379_v8  ;;  %v4387_v16 = vpack.c.bf16 %v4379_v8, %v4379_v8 }
 0x27a   :  { %1456 = vrot.lane.b32.xlu0 %v4367_v23, %s3927_s23 }
 0x27b   :  { %1481 = vrot.lane.b32.xlu1 %v4377_v1, %s3926_s22 }
 0x27e   :  { %1460 = vrot.lane.b32.xlu0 %v4363_v38, %s3927_s23 }
 0x27f   :  { %1485 = vrot.lane.b32.xlu1 %v4387_v16, %s3926_s22 }
 0x282   :  { %1696 = vrot.lane.b32.xlu0 %v4367_v23, %s3928_s24 }
 0x283   :  { %1458 = vrot.lane.b32.xlu1 %v4377_v1, %s3927_s23 }
 0x286   :  { %1700 = vrot.lane.b32.xlu0 %v4363_v38, %s3928_s24 }
 0x287   :  { %1462 = vrot.lane.b32.xlu1 %v4387_v16, %s3927_s23 }
 0x28a   :  { %1820 = vrot.lane.b32.xlu0 %v4367_v23, %s3929_s25 }
 0x28b   :  { %1698 = vrot.lane.b32.xlu1 %v4377_v1, %s3928_s24 }
 0x28e   :  { %1824 = vrot.lane.b32.xlu0 %v4363_v38, %s3929_s25 }
 0x28f   :  { %1702 = vrot.lane.b32.xlu1 %v4387_v16, %s3928_s24 }
 0x292   :  { %2047 = vrot.lane.b32.xlu0 %v4367_v23, %s3930_s26 }
 0x293   :  { %1822 = vrot.lane.b32.xlu1 %v4377_v1, %s3929_s25 }
 0x296   :  { %2051 = vrot.lane.b32.xlu0 %v4363_v38, %s3930_s26 }
 0x297   :  { %1826 = vrot.lane.b32.xlu1 %v4387_v16, %s3929_s25 }
 0x29a   :  { %2171 = vrot.lane.b32.xlu0 %v4367_v23, %s3931_s27 }
 0x29b   :  { %2049 = vrot.lane.b32.xlu1 %v4377_v1, %s3930_s26 }
 0x29e   :  { %2175 = vrot.lane.b32.xlu0 %v4363_v38, %s3931_s27 }
 0x29f   :  { %2053 = vrot.lane.b32.xlu1 %v4387_v16, %s3930_s26 }
 0x2a2   :  { %2295 = vrot.lane.b32.xlu0 %v4367_v23, %s3932_s28 }
 0x2a3   :  { %2173 = vrot.lane.b32.xlu1 %v4377_v1, %s3931_s27 }
 0x2a6   :  { %2299 = vrot.lane.b32.xlu0 %v4363_v38, %s3932_s28 }
 0x2a7   :  { %2177 = vrot.lane.b32.xlu1 %v4387_v16, %s3931_s27 }
 0x2aa   :  { %2419 = vrot.lane.b32.xlu0 %v4367_v23, %s3933_s29 }
 0x2ab   :  { %2297 = vrot.lane.b32.xlu1 %v4377_v1, %s3932_s28 }
 0x2ae   :  { %2423 = vrot.lane.b32.xlu0 %v4363_v38, %s3933_s29 }
 0x2af   :  { %2301 = vrot.lane.b32.xlu1 %v4387_v16, %s3932_s28 }
 0x2b2   :  { %2547 = vperm.xlu0 %3883, %v3819_v31  }
 0x2b3   :  { %2421 = vrot.lane.b32.xlu1 %v4377_v1, %s3933_s29 }
 0x2b7   :  { %2425 = vrot.lane.b32.xlu1 %v4387_v16, %s3933_s29 }
 0x2e8   :  { %v1484_v40 = vpop.permute.xlu0 %1483 }
 0x2e9   :  { %v1480_v52 = vpop.permute.xlu1 %1479 }
 0x2ea   :  { %v1494_v54 = vsel %vm109_vm0, 0, %v1480_v52 }
 0x2eb   :  { %v1496_v59 = vmul.bf16 %v1494_v54, %v4066_v27 }
 0x2ec   :  { %v1457_v48 = vpop.permute.xlu0 %1456 }
 0x2ed   :  { %v1482_v46 = vpop.permute.xlu1 %1481  ;;  %v1506_v2 = vsel %vm158_vm1, %v1496_v59, 0  ;;  %v1471_v12 = vsel %vm46_vm2, 0, %v1457_v48 }
 0x2ee   :  { %v1487_v47 = vsel %vm109_vm0, %v1480_v52, %v1482_v46  ;;  %v1488_v3 = vsel %vm109_vm0, %v1482_v46, %v1484_v40  ;;  %v1473_v41 = vmul.bf16 %v1471_v12, %v4081_v35 }
 0x2ef   :  { %v1497_v19 = vmul.bf16 %v1487_v47, %v4073_v30  ;;  %v1498_v11 = vmul.bf16 %v1488_v3, %v4078_v32  ;;  %v3784_v47 = vld [vmem:[%s4867_s2 + $0x2c] sm:$0xf] }
 0x2f0   :  { %v1461_v6 = vpop.permute.xlu0 %1460  ;;  %v1603_v21 = vsel %vm158_vm1, %v1473_v41, 0 }
 0x2f1   :  { %3776 = vmatprep.subr.msk.bf16.mxu0 %vm158_vm1, %v1497_v19  ;;  %v1486_v26 = vpop.permute.xlu1 %1485  ;;  %v1512_v36 = vsel %vm158_vm1, %v1498_v11, 0 }
 0x2f2   :  { %v1489_v24 = vsel %vm109_vm0, %v1484_v40, %v1486_v26  ;;  %1532 = vmatpush1.bf16.msra.mxu0 %v1506_v2 }
 0x2f3   :  { %v1499_v49 = vmul.bf16 %v1489_v24, %v4070_v29 }
 0x2f4   :  { %v1697_v28 = vpop.permute.xlu0 %1696 }
 0x2f5   :  { %3777 = vmatmul.mubr.msk.bf16.vlgmr.msra.gmra.mxu0 %vm154_vm3, %v3775_v45  ;;  %3778 = vmatprep.subr.msk.bf16.mxu1 %vm158_vm1, %v1499_v49  ;;  %v1459_v33 = vpop.permute.xlu1 %1458  ;;  %v1711_v55 = vsel %vm358_vm4, 0, %v1697_v28 }
 0x2f6   :  { %v1464_v58 = vsel %vm46_vm2, %v1457_v48, %v1459_v33  ;;  %v1465_v20 = vsel %vm46_vm2, %v1459_v33, %v1461_v6  ;;  %1573 = vmatpush1.bf16.msra.mxu1 %v1512_v36  ;;  %1646 = vmatprep.mubr.bf16.mxu0 %v4925_v4  ;;  %v1713_v14 = vmul.bf16 %v1711_v55, %v4122_v63  ;;  %v3789_v36 = vld [vmem:[%s4867_s2 + $0x30] sm:$0xf]  ;;  %v4930_v55 = vld [vmem:[#allocation3_spill] sm:$0xff] }
 0x2f7   :  { %v1474_v42 = vmul.bf16 %v1464_v58, %v4094_v44  ;;  %v1475_v53 = vmul.bf16 %v1465_v20, %v4110_v56 }
 0x2f8   :  { %v1701_v43 = vpop.permute.xlu0 %1700  ;;  %v1723_v48 = vsel %vm158_vm1, %v1713_v14, 0 }
 0x2f9   :  { %3779 = vmatmul.mubr.msk.bf16.vlgmr.msra.gmra.mxu1 %vm154_vm3, %v3775_v45  ;;  %3780 = vmatprep.subr.msk.bf16.mxu0 %vm158_vm1, %v1474_v42  ;;  %v1463_v22 = vpop.permute.xlu1 %1462  ;;  %v1609_v5 = vsel %vm158_vm1, %v1475_v53, 0  ;;  %v1950_v53 = vsel %vm158_vm1, %v4367_v23, 0  ;;  %v1956_v23 = vsel %vm158_vm1, %v4363_v38, 0 }
 0x2fa   :  { %v1466_v13 = vsel %vm46_vm2, %v1461_v6, %v1463_v22  ;;  %1629 = vmatpush1.bf16.msra.mxu0 %v1603_v21  ;;  %1687 = vmatprep.mubr.bf16.mxu1 %v4925_v4 }
 0x2fb   :  { %v1476_v9 = vmul.bf16 %v1466_v13, %v4113_v57 }
 0x2fc   :  { %v1821_v10 = vpop.permute.xlu0 %1820 }
 0x2fd   :  { %3781 = vmatmul.mubr.msk.bf16.vlgmr.msra.gmra.mxu0 %vm154_vm3, %v3774_v15  ;;  %3782 = vmatprep.subr.msk.bf16.mxu1 %vm158_vm1, %v1476_v9  ;;  %v1699_v0 = vpop.permute.xlu1 %1698  ;;  %v1835_v59 = vsel %vm500_vm5, 0, %v1821_v10 }
 0x2fe   :  { %v1704_v60 = vsel %vm358_vm4, %v1697_v28, %v1699_v0  ;;  %v1705_v62 = vsel %vm358_vm4, %v1699_v0, %v1701_v43  ;;  %1670 = vmatpush1.bf16.msra.mxu1 %v1609_v5  ;;  %1766 = vmatprep.mubr.bf16.mxu0 %v4925_v4  ;;  %v1837_v6 = vmul.bf16 %v1835_v59, %v4153_v34  ;;  %v4932_v5 = vld [vmem:[#allocation5_spill] sm:$0xff]  ;;  %v4934_v59 = vld [vmem:[#allocation7_spill] sm:$0xff] }
 0x2ff   :  { %v1714_v31 = vmul.bf16 %v1704_v60, %v4128_v7  ;;  %v1715_v52 = vmul.bf16 %v1705_v62, %v4141_v17 }
 0x300   :  { %v1825_v40 = vpop.permute.xlu0 %1824  ;;  %v1847_v41 = vsel %vm158_vm1, %v1837_v6, 0 }
 0x301   :  { %3783 = vmatmul.mubr.msk.bf16.vlgmr.msra.gmra.mxu1 %vm154_vm3, %v3774_v15  ;;  %3785 = vmatprep.subr.msk.bf16.mxu0 %vm158_vm1, %v1714_v31  ;;  %v1703_v54 = vpop.permute.xlu1 %1702  ;;  %v1729_v26 = vsel %vm158_vm1, %v1715_v52, 0  ;;  %v4931_v15 = vld [vmem:[#allocation2_spill] sm:$0xff]  ;;  %v4933_v31 = vld [vmem:[#allocation4_spill] sm:$0xff] }
 0x302   :  { %v1706_v46 = vsel %vm358_vm4, %v1701_v43, %v1703_v54  ;;  %1749 = vmatpush1.bf16.msra.mxu0 %v1723_v48  ;;  %1807 = vmatprep.mubr.bf16.mxu1 %v4925_v4 }
 0x303   :  { %v1716_v3 = vmul.bf16 %v1706_v46, %v4144_v18 }
 0x304   :  { %v2048_v19 = vpop.permute.xlu0 %2047 }
 0x305   :  { %3786 = vmatmul.mubr.msk.bf16.vlgmr.msra.gmra.mxu0 %vm154_vm3, %v3784_v47  ;;  %3787 = vmatprep.subr.msk.bf16.mxu1 %vm158_vm1, %v1716_v3  ;;  %v1823_v11 = vpop.permute.xlu1 %1822 }
 0x306   :  { %v1828_v2 = vsel %vm500_vm5, %v1821_v10, %v1823_v11  ;;  %v1829_v12 = vsel %vm500_vm5, %v1823_v11, %v1825_v40  ;;  %1790 = vmatpush1.bf16.msra.mxu1 %v1729_v26  ;;  %1890 = vmatprep.mubr.bf16.mxu0 %v4925_v4 }
 0x307   :  { %v1838_v24 = vmul.bf16 %v1828_v2, %v4159_v39  ;;  %v1839_v49 = vmul.bf16 %v1829_v12, %v4172_v50  ;;  %v3799_v12 = vld [vmem:[%s4867_s2 + $0x38] sm:$0xf] }
 0x308   :  { %v2052_v45 = vpop.permute.xlu0 %2051 }
 0x309   :  { %3788 = vmatmul.mubr.msk.bf16.vlgmr.msra.gmra.mxu1 %vm154_vm3, %v3784_v47  ;;  %3790 = vmatprep.subr.msk.bf16.mxu0 %vm158_vm1, %v1838_v24  ;;  %v1827_v28 = vpop.permute.xlu1 %1826  ;;  %v1853_v43 = vsel %vm158_vm1, %v1839_v49, 0  ;;  %v4935_v47 = vld [vmem:[#allocation6_spill] sm:$0xff]  ;;  %v4936_v24 = vld [vmem:[#allocation9_spill] sm:$0xff]  ;;  %v4937_v49 = vld [vmem:[#allocation8_spill] sm:$0xff] }
 0x30a   :  { %v1830_v33 = vsel %vm500_vm5, %v1825_v40, %v1827_v28  ;;  %1873 = vmatpush1.bf16.msra.mxu0 %v1847_v41  ;;  %1931 = vmatprep.mubr.bf16.mxu1 %v4925_v4 }
 0x30b   :  { %v1840_v58 = vmul.bf16 %v1830_v33, %v4175_v51  ;;  %3795 = vmatprep.subr.msk.bf16.mxu0 %vm158_vm1, %v4377_v1 }
 0x30c   :  { %v2172_v20 = vpop.permute.xlu0 %2171 }
 0x30d   :  { %3791 = vmatmul.mubr.msk.bf16.vlgmr.msra.gmra.mxu0 %vm154_vm3, %v3789_v36  ;;  %3792 = vmatprep.subr.msk.bf16.mxu1 %vm158_vm1, %v1840_v58  ;;  %v2050_v42 = vpop.permute.xlu1 %2049 }
 0x30e   :  { %v2055_v22 = vsel %vm745_vm6, %v2048_v19, %v2050_v42  ;;  %v2056_v21 = vsel %vm745_vm6, %v2050_v42, %v2052_v45  ;;  %1914 = vmatpush1.bf16.msra.mxu1 %v1853_v43  ;;  %1976 = vmatpush1.bf16.msra.mxu0 %v1950_v53  ;;  %v4938_v42 = vld [vmem:[#allocation11_spill] sm:$0xff]  ;;  %v4939_v53 = vld [vmem:[#allocation10_spill] sm:$0xff] }
 0x30f   :  { %v2065_v13 = vmul.bf16 %v2056_v21, %v4930_v55  ;;  %3797 = vmatprep.subr.msk.bf16.mxu1 %vm158_vm1, %v4387_v16  ;;  %1993 = vmatprep.mubr.bf16.mxu0 %v4925_v4  ;;  %v2064_v9 = vmul.bf16 %v2055_v22, %v4931_v15  ;;  %v3794_v16 = vld [vmem:[%s4867_s2 + $0x34] sm:$0xf] }
 0x310   :  { %v2176_v1 = vpop.permute.xlu0 %2175 }
 0x311   :  { %3793 = vmatmul.mubr.msk.bf16.vlgmr.msra.gmra.mxu1 %vm154_vm3, %v3789_v36  ;;  %v2054_v10 = vpop.permute.xlu1 %2053  ;;  %3800 = vmatprep.subr.msk.bf16.mxu0 %vm158_vm1, %v2065_v13  ;;  %v2074_v38 = vsel %vm158_vm1, %v2064_v9, 0 }
 0x312   :  { %v2057_v14 = vsel %vm745_vm6, %v2052_v45, %v2054_v10  ;;  %v2062_v0 = vsel %vm745_vm6, %v2054_v10, 0  ;;  %2017 = vmatpush1.bf16.msra.mxu1 %v1956_v23  ;;  %2034 = vmatprep.mubr.bf16.mxu1 %v4925_v4  ;;  %v3804_v10 = vld [vmem:[%s4867_s2 + $0x3c] sm:$0xf] }
 0x313   :  { %v2067_v60 = vmul.bf16 %v2062_v0, %v4932_v5  ;;  %v2066_v40 = vmul.bf16 %v2057_v14, %v4933_v31  ;;  %v4940_v23 = vld [vmem:[#allocation13_spill] sm:$0xff] }
 0x314   :  { %v2296_v62 = vpop.permute.xlu0 %2295 }
 0x315   :  { %3802 = vmatprep.subr.msk.bf16.mxu1 %vm158_vm1, %v2067_v60  ;;  %v2174_v52 = vpop.permute.xlu1 %2173  ;;  %3796 = vmatmul.mubr.msk.bf16.vlgmr.msra.gmra.mxu0 %vm154_vm3, %v3794_v16  ;;  %v2080_v6 = vsel %vm158_vm1, %v2066_v40, 0 }
 0x316   :  { %v2179_v54 = vsel %vm887_vm7, %v2172_v20, %v2174_v52  ;;  %v2180_v48 = vsel %vm887_vm7, %v2174_v52, %v2176_v1  ;;  %2100 = vmatpush1.bf16.msra.mxu0 %v2074_v38  ;;  %2117 = vmatprep.mubr.bf16.mxu0 %v4925_v4 }
 0x317   :  { %v2189_v46 = vmul.bf16 %v2180_v48, %v4934_v59  ;;  %v2188_v3 = vmul.bf16 %v2179_v54, %v4935_v47  ;;  %v4942_v54 = vld [vmem:[#allocation15_spill] sm:$0xff] }
 0x318   :  { %v2300_v19 = vpop.permute.xlu0 %2299 }
 0x319   :  { %3798 = vmatmul.mubr.msk.bf16.vlgmr.msra.gmra.mxu1 %vm154_vm3, %v3794_v16  ;;  %v2178_v11 = vpop.permute.xlu1 %2177  ;;  %3805 = vmatprep.subr.msk.bf16.mxu0 %vm158_vm1, %v2189_v46  ;;  %v2198_v33 = vsel %vm158_vm1, %v2188_v3, 0  ;;  %v4941_v16 = vld [vmem:[#allocation12_spill] sm:$0xff]  ;;  %v4943_v46 = vld [vmem:[#allocation14_spill] sm:$0xff] }
 0x31a   :  { %2141 = vmatpush1.bf16.msra.mxu1 %v2080_v6  ;;  %v2181_v26 = vsel %vm887_vm7, %v2176_v1, %v2178_v11  ;;  %v2186_v2 = vsel %vm887_vm7, %v2178_v11, 0  ;;  %2158 = vmatprep.mubr.bf16.mxu1 %v4925_v4 }
 0x31b   :  { %v2191_v45 = vmul.bf16 %v2186_v2, %v4936_v24  ;;  %v2190_v28 = vmul.bf16 %v2181_v26, %v4937_v49  ;;  %v3809_v2 = vld [vmem:[%s4867_s2 + $0x40] sm:$0xf] }
 0x31c   :  { %v2420_v20 = vpop.permute.xlu0 %2419 }
 0x31d   :  { %3807 = vmatprep.subr.msk.bf16.mxu1 %vm158_vm1, %v2191_v45  ;;  %v2298_v41 = vpop.permute.xlu1 %2297  ;;  %3801 = vmatmul.mubr.msk.bf16.vlgmr.msra.gmra.mxu0 %vm154_vm3, %v3799_v12  ;;  %v2204_v21 = vsel %vm158_vm1, %v2190_v28, 0  ;;  %v4945_v28 = vld [vmem:[#allocation16_spill] sm:$0xff] }
 0x31e   :  { %v2303_v36 = vsel %vm1029_vm8, %v2296_v62, %v2298_v41  ;;  %v2304_v58 = vsel %vm1029_vm8, %v2298_v41, %v2300_v19  ;;  %2224 = vmatpush1.bf16.msra.mxu0 %v2198_v33  ;;  %2241 = vmatprep.mubr.bf16.mxu0 %v4925_v4 }
 0x31f   :  { %v2313_v43 = vmul.bf16 %v2304_v58, %v4938_v42  ;;  %v2312_v22 = vmul.bf16 %v2303_v36, %v4939_v53  ;;  %v3814_v58 = vld [vmem:[%s4867_s2 + $0x44] sm:$0xf] }
 0x320   :  { %v2424_v0 = vpop.permute.xlu0 %2423 }
 0x321   :  { %3803 = vmatmul.mubr.msk.bf16.vlgmr.msra.gmra.mxu1 %vm154_vm3, %v3799_v12  ;;  %v2302_v13 = vpop.permute.xlu1 %2301  ;;  %3810 = vmatprep.subr.msk.bf16.mxu0 %vm158_vm1, %v2313_v43  ;;  %v2322_v40 = vsel %vm158_vm1, %v2312_v22, 0  ;;  %v4944_v12 = vld [vmem:[#allocation17_spill] sm:$0xff] }
 0x322   :  { %2265 = vmatpush1.bf16.msra.mxu1 %v2204_v21  ;;  %v2305_v1 = vsel %vm1029_vm8, %v2300_v19, %v2302_v13  ;;  %v2310_v9 = vsel %vm1029_vm8, %v2302_v13, 0  ;;  %2282 = vmatprep.mubr.bf16.mxu1 %v4925_v4 }
 0x323   :  { %v2315_v14 = vmul.bf16 %v2310_v9, %v4940_v23  ;;  %v2314_v60 = vmul.bf16 %v2305_v1, %v4941_v16 }
 0x325   :  { %3812 = vmatprep.subr.msk.bf16.mxu1 %vm158_vm1, %v2315_v14  ;;  %v2422_v62 = vpop.permute.xlu1 %2421  ;;  %3806 = vmatmul.mubr.msk.bf16.vlgmr.msra.gmra.mxu0 %vm154_vm3, %v3804_v10  ;;  %v2328_v19 = vsel %vm158_vm1, %v2314_v60, 0 }
 0x326   :  { %v2427_v52 = vsel %vm1171_vm9, %v2420_v20, %v2422_v62  ;;  %v2428_v38 = vsel %vm1171_vm9, %v2422_v62, %v2424_v0  ;;  %2348 = vmatpush1.bf16.msra.mxu0 %v2322_v40  ;;  %2365 = vmatprep.mubr.bf16.mxu0 %v4925_v4 }
 0x327   :  { %v2437_v48 = vmul.bf16 %v2428_v38, %v4942_v54  ;;  %v2436_v3 = vmul.bf16 %v2427_v52, %v4943_v46 }
 0x329   :  { %3808 = vmatmul.mubr.msk.bf16.vlgmr.msra.gmra.mxu1 %vm154_vm3, %v3804_v10  ;;  %v2426_v6 = vpop.permute.xlu1 %2425  ;;  %3815 = vmatprep.subr.msk.bf16.mxu0 %vm158_vm1, %v2437_v48  ;;  %v2446_v33 = vsel %vm158_vm1, %v2436_v3, 0 }
 0x32a   :  { %2389 = vmatpush1.bf16.msra.mxu1 %v2328_v19  ;;  %v2429_v11 = vsel %vm1171_vm9, %v2424_v0, %v2426_v6  ;;  %v2434_v26 = vsel %vm1171_vm9, %v2426_v6, 0  ;;  %2406 = vmatprep.mubr.bf16.mxu1 %v4925_v4 }
 0x32b   :  { %v2439_v45 = vmul.bf16 %v2434_v26, %v4944_v12  ;;  %v2438_v41 = vmul.bf16 %v2429_v11, %v4945_v28 }
 0x32d   :  { %3811 = vmatmul.mubr.msk.bf16.vlgmr.msra.gmra.mxu0 %vm154_vm3, %v3809_v2  ;;  %3817 = vmatprep.subr.msk.bf16.mxu1 %vm158_vm1, %v2439_v45  ;;  %v2452_v36 = vsel %vm158_vm1, %v2438_v41, 0 }
 0x32e   :  { %2472 = vmatpush1.bf16.msra.mxu0 %v2446_v33  ;;  %2489 = vmatprep.mubr.bf16.mxu0 %v4925_v4 }
 0x331   :  { %3813 = vmatmul.mubr.msk.bf16.vlgmr.msra.gmra.mxu1 %vm154_vm3, %v3809_v2 }
 0x332   :  { %2513 = vmatpush1.bf16.msra.mxu1 %v2452_v36  ;;  %2530 = vmatprep.mubr.bf16.mxu1 %v4925_v4 }
 0x335   :  { %3816 = vmatmul.mubr.msk.bf16.vlgmr.msra.gmra.mxu0 %vm154_vm3, %v3814_v58 }
 0x336   :  { %2659 = vmatprep.mubr.bf16.mxu0 %v4925_v4 }
 0x339   :  { %3818 = vmatmul.mubr.msk.bf16.vlgmr.msra.gmra.mxu1 %vm154_vm3, %v3814_v58 }
 0x33a   :  { %2700 = vmatprep.mubr.bf16.mxu1 %v4925_v4 }
 0x3b5   :  { %v1551_v20 = vpop.f32.mrf.mxu0 }
 0x3b7   :  { %v1553_v43 = vpop.f32.mrf.mxu0 }
 0x3b9   :  { %v1555_v22 = vpop.f32.mrf.mxu0  ;;  %v1592_v21 = vpop.f32.mrf.mxu1 }
 0x3bb   :  { %v1556_v13 = vpop.f32.mrf.mxu0  ;;  %v1594_v1 = vpop.f32.mrf.mxu1 }
 0x3bd   :  { %v1596_v9 = vpop.f32.mrf.mxu1  ;;  %v1648_v10 = vpop.f32.mrf.mxu0 }
 0x3bf   :  { %v1597_v14 = vpop.f32.mrf.mxu1  ;;  %v1650_v0 = vpop.f32.mrf.mxu0 }
 0x3c0   :  { %v1651_v42 = vadd.f32 %v1650_v0, %v1553_v43 }
 0x3c1   :  { %v1652_v60 = vpop.f32.mrf.mxu0  ;;  %v1689_v62 = vpop.f32.mrf.mxu1 }
 0x3c2   :  { %v1690_v49 = vadd.f32 %v1689_v62, %v1592_v21 }
 0x3c3   :  { %v1653_v40 = vpop.f32.mrf.mxu0  ;;  %v1691_v52 = vpop.f32.mrf.mxu1 }
 0x3c5   :  { %v1693_v38 = vpop.f32.mrf.mxu1  ;;  %v1768_v48 = vpop.f32.mrf.mxu0 }
 0x3c7   :  { %v1694_v3 = vpop.f32.mrf.mxu1  ;;  %v1770_v19 = vpop.f32.mrf.mxu0 }
 0x3c9   :  { %v1772_v6 = vpop.f32.mrf.mxu0  ;;  %v1809_v11 = vpop.f32.mrf.mxu1 }
 0x3ca   :  { %v1818_v47 = vadd.f32 %v1809_v11, %v1690_v49  ;;  %v2548_v11 = vpop.permute.xlu0 %2547 }
 0x3cb   :  { %v1773_v26 = vpop.f32.mrf.mxu0  ;;  %v1811_v2 = vpop.f32.mrf.mxu1 }
 0x3cd   :  { %v1813_v45 = vpop.f32.mrf.mxu1  ;;  %v1892_v41 = vpop.f32.mrf.mxu0 }
 0x3cf   :  { %v1814_v33 = vpop.f32.mrf.mxu1  ;;  %v1894_v36 = vpop.f32.mrf.mxu0 }
 0x3d1   :  { %v1896_v58 = vpop.f32.mrf.mxu0  ;;  %v1933_v22 = vpop.f32.mrf.mxu1 }
 0x3d2   :  { %v1942_v55 = vadd.f32 %v1933_v22, %v1818_v47 }
 0x3d3   :  { %v1897_v13 = vpop.f32.mrf.mxu0  ;;  %v1935_v9 = vpop.f32.mrf.mxu1 }
 0x3d5   :  { %v1937_v14 = vpop.f32.mrf.mxu1  ;;  %v1995_v60 = vpop.f32.mrf.mxu0 }
 0x3d6   :  { %v1649_v14 = vadd.f32 %v1648_v10, %v1551_v20 }
 0x3d7   :  { %v1938_v40 = vpop.f32.mrf.mxu1  ;;  %v1997_v8 = vpop.f32.mrf.mxu0 }
 0x3d9   :  { %v1999_v38 = vpop.f32.mrf.mxu0  ;;  %v2036_v37 = vpop.f32.mrf.mxu1 }
 0x3da   :  { %v1816_v38 = vadd.f32 %v1768_v48, %v1649_v14 }
 0x3db   :  { %v2000_v3 = vpop.f32.mrf.mxu0  ;;  %v2038_v61 = vpop.f32.mrf.mxu1 }
 0x3dc   :  { %v1940_v24 = vadd.f32 %v1892_v41, %v1816_v38 }
 0x3dd   :  { %v2040_v6 = vpop.f32.mrf.mxu1  ;;  %v2119_v25 = vpop.f32.mrf.mxu0 }
 0x3de   :  { %v1817_v6 = vadd.f32 %v1770_v19, %v1651_v42  ;;  %v2043_v31 = vadd.f32 %v1995_v60, %v1940_v24 }
 0x3df   :  { %v2041_v26 = vpop.f32.mrf.mxu1  ;;  %v2121_v28 = vpop.f32.mrf.mxu0 }
 0x3e1   :  { %v2123_v45 = vpop.f32.mrf.mxu0  ;;  %v2160_v12 = vpop.f32.mrf.mxu1 }
 0x3e2   :  { %v1692_v45 = vadd.f32 %v1691_v52, %v1594_v1 }
 0x3e3   :  { %v2124_v33 = vpop.f32.mrf.mxu0  ;;  %v2162_v54 = vpop.f32.mrf.mxu1 }
 0x3e4   :  { %v1941_v33 = vadd.f32 %v1894_v36, %v1817_v6 }
 0x3e5   :  { %v2164_v58 = vpop.f32.mrf.mxu1  ;;  %v2243_v46 = vpop.f32.mrf.mxu0 }
 0x3e6   :  { %v2044_v20 = vadd.f32 %v1997_v8, %v1941_v33 }
 0x3e7   :  { %v2165_v13 = vpop.f32.mrf.mxu1  ;;  %v2245_v16 = vpop.f32.mrf.mxu0 }
 0x3e8   :  { %v1819_v13 = vadd.f32 %v1811_v2, %v1692_v45  ;;  %v2168_v48 = vadd.f32 %v2121_v28, %v2044_v20 }
 0x3e9   :  { %v2247_v23 = vpop.f32.mrf.mxu0  ;;  %v2284_v40 = vpop.f32.mrf.mxu1 }
 0x3ea   :  { %v2167_v23 = vadd.f32 %v2119_v25, %v2043_v31  ;;  %v1943_v0 = vadd.f32 %v1935_v9, %v1819_v13  ;;  %v2292_v1 = vadd.f32 %v2245_v16, %v2168_v48 }
 0x3eb   :  { %v2248_v53 = vpop.f32.mrf.mxu0  ;;  %v2286_v3 = vpop.f32.mrf.mxu1 }
 0x3ec   :  { %v2045_v53 = vadd.f32 %v2036_v37, %v1942_v55  ;;  %v2291_v21 = vadd.f32 %v2243_v46, %v2167_v23  ;;  %v2046_v19 = vadd.f32 %v2038_v61, %v1943_v0  ;;  %v3865_v23 = vld [vmem:[%s4868_s4 + $0x10] sm:$0xff] }
 0x3ed   :  { %v2288_v26 = vpop.f32.mrf.mxu1  ;;  %v2367_v59 = vpop.f32.mrf.mxu0 }
 0x3ee   :  { %v2169_v41 = vadd.f32 %v2160_v12, %v2045_v53  ;;  %v2415_v49 = vadd.f32 %v2367_v59, %v2291_v21  ;;  %v2170_v36 = vadd.f32 %v2162_v54, %v2046_v19 }
 0x3ef   :  { %v2289_v58 = vpop.f32.mrf.mxu1  ;;  %v2369_v5 = vpop.f32.mrf.mxu0 }
 0x3f0   :  { %v2293_v2 = vadd.f32 %v2284_v40, %v2169_v41  ;;  %v2416_v47 = vadd.f32 %v2369_v5, %v2292_v1  ;;  %v2294_v22 = vadd.f32 %v2286_v3, %v2170_v36 }
 0x3f1   :  { %v2371_v10 = vpop.f32.mrf.mxu0  ;;  %v2408_v43 = vpop.f32.mrf.mxu1 }
 0x3f2   :  { %v2417_v9 = vadd.f32 %v2408_v43, %v2293_v2 }
 0x3f3   :  { %v2372_v42 = vpop.f32.mrf.mxu0  ;;  %v2410_v62 = vpop.f32.mrf.mxu1 }
 0x3f4   :  { %v2418_v60 = vadd.f32 %v2410_v62, %v2294_v22 }
 0x3f5   :  { %v2412_v52 = vpop.f32.mrf.mxu1  ;;  %v2491_v24 = vpop.f32.mrf.mxu0 }
 0x3f6   :  { %v2539_v8 = vadd.f32 %v2491_v24, %v2415_v49 }
 0x3f7   :  { %v2413_v25 = vpop.f32.mrf.mxu1  ;;  %v2493_v31 = vpop.f32.mrf.mxu0 }
 0x3f8   :  { %v2550_v37 = vadd.f32 %v2548_v11, %v2539_v8  ;;  %v2540_v55 = vadd.f32 %v2493_v31, %v2416_v47 }
 0x3f9   :  { %v2495_v46 = vpop.f32.mrf.mxu0  ;;  %v2532_v28 = vpop.f32.mrf.mxu1 }
 0x3fa   :  { %v2554_v61 = vmax.f32 %v2550_v37, 0.0  ;;  %v2551_v12 = vadd.f32 %v2548_v11, %v2540_v55  ;;  %v2541_v16 = vadd.f32 %v2532_v28, %v2417_v9  ;;  %v3820_v9 = vld [vmem:[%s4867_s2 + $0x48] sm:$0xf] }
 0x3fb   :  { %v2496_v59 = vpop.f32.mrf.mxu0  ;;  %v2534_v14 = vpop.f32.mrf.mxu1 }
 0x3fc   :  { %v4615_v38 = vpack.c.bf16 %v2554_v61, %v2554_v61  ;;  %v2555_v54 = vmax.f32 %v2551_v12, 0.0  ;;  %v2552_v40 = vadd.f32 %v2548_v11, %v2541_v16  ;;  %v2542_v5 = vadd.f32 %v2534_v14, %v2418_v60 }
 0x3fd   :  { %v2536_v6 = vpop.f32.mrf.mxu1 }
 0x3fe   :  { %v4617_v26 = vpack.c.bf16 %v2555_v54, %v2555_v54  ;;  %v2556_v3 = vmax.f32 %v2552_v40, 0.0  ;;  %v2553_v45 = vadd.f32 %v2548_v11, %v2542_v5  ;;  %2589 = vrot.lane.b32.xlu1 %v4615_v38, %s3926_s22  ;;  %v3830_v54 = vld [vmem:[%s4867_s2 + $0x50] sm:$0xf] }
 0x3ff   :  { %v2537_v33 = vpop.f32.mrf.mxu1 }
 0x400   :  { %v4621_v58 = vpack.c.bf16 %v2556_v3, %v2556_v3  ;;  %v2557_v13 = vmax.f32 %v2553_v45, 0.0  ;;  %2591 = vrot.lane.b32.xlu0 %v4617_v26, %s3926_s22 }
 0x402   :  { %v4625_v20 = vpack.c.bf16 %v2557_v13, %v2557_v13  ;;  %2593 = vrot.lane.b32.xlu1 %v4621_v58, %s3926_s22 }
 0x404   :  { %2595 = vrot.lane.b32.xlu0 %v4625_v20, %s3926_s22 }
 0x406   :  { %2566 = vrot.lane.b32.xlu1 %v4615_v38, %s3927_s23 }
 0x408   :  { %2568 = vrot.lane.b32.xlu0 %v4617_v26, %s3927_s23 }
 0x40a   :  { %2570 = vrot.lane.b32.xlu1 %v4621_v58, %s3927_s23 }
 0x40c   :  { %2572 = vrot.lane.b32.xlu0 %v4625_v20, %s3927_s23 }
 0x40e   :  { %2806 = vrot.lane.b32.xlu1 %v4615_v38, %s3928_s24 }
 0x410   :  { %2808 = vrot.lane.b32.xlu0 %v4617_v26, %s3928_s24 }
 0x412   :  { %2810 = vrot.lane.b32.xlu1 %v4621_v58, %s3928_s24 }
 0x414   :  { %2812 = vrot.lane.b32.xlu0 %v4625_v20, %s3928_s24 }
 0x416   :  { %2930 = vrot.lane.b32.xlu1 %v4615_v38, %s3929_s25 }
 0x418   :  { %2932 = vrot.lane.b32.xlu0 %v4617_v26, %s3929_s25 }
 0x41a   :  { %2934 = vrot.lane.b32.xlu1 %v4621_v58, %s3929_s25 }
 0x41c   :  { %2936 = vrot.lane.b32.xlu0 %v4625_v20, %s3929_s25 }
 0x41e   :  { %3157 = vrot.lane.b32.xlu1 %v4615_v38, %s3930_s26 }
 0x420   :  { %3159 = vrot.lane.b32.xlu0 %v4617_v26, %s3930_s26 }
 0x422   :  { %3161 = vrot.lane.b32.xlu1 %v4621_v58, %s3930_s26 }
 0x424   :  { %3163 = vrot.lane.b32.xlu0 %v4625_v20, %s3930_s26 }
 0x426   :  { %3281 = vrot.lane.b32.xlu1 %v4615_v38, %s3931_s27 }
 0x428   :  { %3283 = vrot.lane.b32.xlu0 %v4617_v26, %s3931_s27 }
 0x42a   :  { %3285 = vrot.lane.b32.xlu1 %v4621_v58, %s3931_s27 }
 0x42c   :  { %3287 = vrot.lane.b32.xlu0 %v4625_v20, %s3931_s27 }
 0x42e   :  { %3405 = vrot.lane.b32.xlu1 %v4615_v38, %s3932_s28 }
 0x430   :  { %3407 = vrot.lane.b32.xlu0 %v4617_v26, %s3932_s28 }
 0x432   :  { %3409 = vrot.lane.b32.xlu1 %v4621_v58, %s3932_s28 }
 0x434   :  { %3411 = vrot.lane.b32.xlu0 %v4625_v20, %s3932_s28 }
 0x436   :  { %3529 = vrot.lane.b32.xlu1 %v4615_v38, %s3933_s29 }
 0x438   :  { %3531 = vrot.lane.b32.xlu0 %v4617_v26, %s3933_s29 }
 0x43a   :  { %3533 = vrot.lane.b32.xlu1 %v4621_v58, %s3933_s29 }
 0x43c   :  { %3535 = vrot.lane.b32.xlu0 %v4625_v20, %s3933_s29 }
 0x43e   :  { %3657 = vperm.xlu1 %3884, %v3865_v23  }
 0x470   :  { %v2590_v10 = vpop.permute.xlu1 %2589 }
 0x471   :  { %v2604_v43 = vsel %vm109_vm0, 0, %v2590_v10 }
 0x472   :  { %v2606_v0 = vmul.bf16 %v2604_v43, %v4066_v27  ;;  %v2592_v53 = vpop.permute.xlu0 %2591  ;;  %v3821_v27 = vld [vmem:[%s4867_s2 + $0x4c] sm:$0xf] }
 0x473   :  { %v2597_v48 = vsel %vm109_vm0, %v2590_v10, %v2592_v53 }
 0x474   :  { %v2607_v21 = vmul.bf16 %v2597_v48, %v4073_v30  ;;  %v2594_v42 = vpop.permute.xlu1 %2593  ;;  %v2616_v1 = vsel %vm158_vm1, %v2606_v0, 0  ;;  %v3835_v0 = vld [vmem:[%s4867_s2 + $0x54] sm:$0xf] }
 0x475   :  { %v2598_v62 = vsel %vm109_vm0, %v2592_v53, %v2594_v42 }
 0x476   :  { %v2608_v19 = vmul.bf16 %v2598_v62, %v4078_v32  ;;  %3822 = vmatprep.subr.msk.bf16.mxu0 %vm158_vm1, %v2607_v21  ;;  %v2596_v41 = vpop.permute.xlu0 %2595  ;;  %v3060_v21 = vsel %vm158_vm1, %v4615_v38, 0  ;;  %v3066_v38 = vsel %vm158_vm1, %v4621_v58, 0 }
 0x477   :  { %v2599_v49 = vsel %vm109_vm0, %v2594_v42, %v2596_v41  ;;  %2642 = vmatpush1.bf16.msra.mxu0 %v2616_v1 }
 0x478   :  { %v2609_v52 = vmul.bf16 %v2599_v49, %v4070_v29  ;;  %v2567_v30 = vpop.permute.xlu1 %2566  ;;  %v2622_v36 = vsel %vm158_vm1, %v2608_v19, 0  ;;  %v4946_v19 = vld [vmem:[#allocation3_spill] sm:$0xff] }
 0x479   :  { %v2581_v24 = vsel %vm46_vm2, 0, %v2567_v30 }
 0x47a   :  { %v2583_v11 = vmul.bf16 %v2581_v24, %v4081_v35  ;;  %3823 = vmatmul.mubr.msk.bf16.vlgmr.msra.gmra.mxu0 %vm154_vm3, %v3821_v27  ;;  %3824 = vmatprep.subr.msk.bf16.mxu1 %vm158_vm1, %v2609_v52  ;;  %v2569_v32 = vpop.permute.xlu0 %2568  ;;  %v4948_v24 = vld [vmem:[#allocation4_spill] sm:$0xff] }
 0x47b   :  { %v2574_v2 = vsel %vm46_vm2, %v2567_v30, %v2569_v32  ;;  %2683 = vmatpush1.bf16.msra.mxu1 %v2622_v36  ;;  %2756 = vmatprep.mubr.bf16.mxu0 %v4925_v4 }
 0x47c   :  { %v2584_v47 = vmul.bf16 %v2574_v2, %v4094_v44  ;;  %v2571_v29 = vpop.permute.xlu1 %2570  ;;  %v2713_v31 = vsel %vm158_vm1, %v2583_v11, 0 }
 0x47d   :  { %v2575_v8 = vsel %vm46_vm2, %v2569_v32, %v2571_v29 }
 0x47e   :  { %v2585_v25 = vmul.bf16 %v2575_v8, %v4110_v56  ;;  %3825 = vmatmul.mubr.msk.bf16.vlgmr.msra.gmra.mxu1 %vm154_vm3, %v3821_v27  ;;  %3826 = vmatprep.subr.msk.bf16.mxu0 %vm158_vm1, %v2584_v47  ;;  %v2573_v35 = vpop.permute.xlu0 %2572 }
 0x47f   :  { %v2576_v22 = vsel %vm46_vm2, %v2571_v29, %v2573_v35  ;;  %2739 = vmatpush1.bf16.msra.mxu0 %v2713_v31  ;;  %2797 = vmatprep.mubr.bf16.mxu1 %v4925_v4  ;;  %v4949_v29 = vld [vmem:[#allocation6_spill] sm:$0xff] }
 0x480   :  { %v2586_v44 = vmul.bf16 %v2576_v22, %v4113_v57  ;;  %v2807_v37 = vpop.permute.xlu1 %2806  ;;  %v2719_v28 = vsel %vm158_vm1, %v2585_v25, 0  ;;  %v4950_v25 = vld [vmem:[#allocation7_spill] sm:$0xff] }
 0x481   :  { %v2821_v56 = vsel %vm358_vm4, 0, %v2807_v37 }
 0x482   :  { %v2823_v55 = vmul.bf16 %v2821_v56, %v4122_v63  ;;  %3827 = vmatmul.mubr.msk.bf16.vlgmr.msra.gmra.mxu0 %vm154_vm3, %v3820_v9  ;;  %3828 = vmatprep.subr.msk.bf16.mxu1 %vm158_vm1, %v2586_v44  ;;  %v2809_v46 = vpop.permute.xlu0 %2808  ;;  %v4951_v56 = vld [vmem:[#allocation9_spill] sm:$0xff] }
 0x483   :  { %v2814_v60 = vsel %vm358_vm4, %v2807_v37, %v2809_v46  ;;  %2780 = vmatpush1.bf16.msra.mxu1 %v2719_v28  ;;  %2876 = vmatprep.mubr.bf16.mxu0 %v4925_v4  ;;  %v3845_v37 = vld [vmem:[%s4867_s2 + $0x5c] sm:$0xf]  ;;  %v4952_v28 = vld [vmem:[#allocation8_spill] sm:$0xff] }
 0x484   :  { %v2824_v61 = vmul.bf16 %v2814_v60, %v4128_v7  ;;  %v2811_v57 = vpop.permute.xlu1 %2810  ;;  %v2833_v59 = vsel %vm158_vm1, %v2823_v55, 0 }
 0x485   :  { %v2815_v12 = vsel %vm358_vm4, %v2809_v46, %v2811_v57 }
 0x486   :  { %v2825_v16 = vmul.bf16 %v2815_v12, %v4141_v17  ;;  %3829 = vmatmul.mubr.msk.bf16.vlgmr.msra.gmra.mxu1 %vm154_vm3, %v3820_v9  ;;  %3831 = vmatprep.subr.msk.bf16.mxu0 %vm158_vm1, %v2824_v61  ;;  %v2813_v63 = vpop.permute.xlu0 %2812 }
 0x487   :  { %v2816_v14 = vsel %vm358_vm4, %v2811_v57, %v2813_v63  ;;  %2859 = vmatpush1.bf16.msra.mxu0 %v2833_v59  ;;  %2917 = vmatprep.mubr.bf16.mxu1 %v4925_v4  ;;  %v4953_v59 = vld [vmem:[#allocation10_spill] sm:$0xff] }
 0x488   :  { %v2826_v7 = vmul.bf16 %v2816_v14, %v4144_v18  ;;  %v2931_v40 = vpop.permute.xlu1 %2930  ;;  %v2839_v3 = vsel %vm158_vm1, %v2825_v16, 0 }
 0x489   :  { %v2945_v17 = vsel %vm500_vm5, 0, %v2931_v40 }
 0x48a   :  { %v2947_v5 = vmul.bf16 %v2945_v17, %v4153_v34  ;;  %3832 = vmatmul.mubr.msk.bf16.vlgmr.msra.gmra.mxu0 %vm154_vm3, %v3830_v54  ;;  %3833 = vmatprep.subr.msk.bf16.mxu1 %vm158_vm1, %v2826_v7  ;;  %v2933_v6 = vpop.permute.xlu0 %2932 }
 0x48b   :  { %v2938_v45 = vsel %vm500_vm5, %v2931_v40, %v2933_v6  ;;  %2900 = vmatpush1.bf16.msra.mxu1 %v2839_v3  ;;  %3000 = vmatprep.mubr.bf16.mxu0 %v4925_v4  ;;  %v3850_v3 = vld [vmem:[%s4867_s2 + $0x60] sm:$0xf] }
 0x48c   :  { %v2948_v33 = vmul.bf16 %v2938_v45, %v4159_v39  ;;  %v2935_v18 = vpop.permute.xlu1 %2934  ;;  %v2957_v10 = vsel %vm158_vm1, %v2947_v5, 0  ;;  %v4955_v45 = vld [vmem:[#allocation13_spill] sm:$0xff] }
 0x48d   :  { %v2939_v13 = vsel %vm500_vm5, %v2933_v6, %v2935_v18 }
 0x48e   :  { %v2949_v23 = vmul.bf16 %v2939_v13, %v4172_v50  ;;  %3834 = vmatmul.mubr.msk.bf16.vlgmr.msra.gmra.mxu1 %vm154_vm3, %v3830_v54  ;;  %3836 = vmatprep.subr.msk.bf16.mxu0 %vm158_vm1, %v2948_v33  ;;  %v2937_v34 = vpop.permute.xlu0 %2936  ;;  %v4954_v54 = vld [vmem:[#allocation11_spill] sm:$0xff]  ;;  %v4956_v13 = vld [vmem:[#allocation12_spill] sm:$0xff] }
 0x48f   :  { %v2940_v43 = vsel %vm500_vm5, %v2935_v18, %v2937_v34  ;;  %2983 = vmatpush1.bf16.msra.mxu0 %v2957_v10  ;;  %3041 = vmatprep.mubr.bf16.mxu1 %v4925_v4 }
 0x490   :  { %v2950_v39 = vmul.bf16 %v2940_v43, %v4175_v51  ;;  %v3158_v53 = vpop.permute.xlu1 %3157  ;;  %3841 = vmatprep.subr.msk.bf16.mxu0 %vm158_vm1, %v4617_v26  ;;  %v2963_v48 = vsel %vm158_vm1, %v2949_v23, 0 }
 0x492   :  { %3837 = vmatmul.mubr.msk.bf16.vlgmr.msra.gmra.mxu0 %vm154_vm3, %v3835_v0  ;;  %3838 = vmatprep.subr.msk.bf16.mxu1 %vm158_vm1, %v2950_v39  ;;  %v3160_v50 = vpop.permute.xlu0 %3159 }
 0x493   :  { %v3165_v42 = vsel %vm745_vm6, %v3158_v53, %v3160_v50  ;;  %3024 = vmatpush1.bf16.msra.mxu1 %v2963_v48  ;;  %3086 = vmatpush1.bf16.msra.mxu0 %v3060_v21  ;;  %v4957_v53 = vld [vmem:[#allocation14_spill] sm:$0xff]  ;;  %v4958_v48 = vld [vmem:[#allocation15_spill] sm:$0xff] }
 0x494   :  { %v3162_v62 = vpop.permute.xlu1 %3161  ;;  %3843 = vmatprep.subr.msk.bf16.mxu1 %vm158_vm1, %v4625_v20  ;;  %3103 = vmatprep.mubr.bf16.mxu0 %v4925_v4  ;;  %v3174_v26 = vmul.bf16 %v3165_v42, %v4931_v15  ;;  %v3840_v20 = vld [vmem:[%s4867_s2 + $0x58] sm:$0xf] }
 0x495   :  { %v3166_v51 = vsel %vm745_vm6, %v3160_v50, %v3162_v62  ;;  %v4947_v15 = vld [vmem:[#allocation5_spill] sm:$0xff] }
 0x496   :  { %v3175_v41 = vmul.bf16 %v3166_v51, %v4946_v19  ;;  %3839 = vmatmul.mubr.msk.bf16.vlgmr.msra.gmra.mxu1 %vm154_vm3, %v3835_v0  ;;  %v3164_v1 = vpop.permute.xlu0 %3163  ;;  %v3184_v58 = vsel %vm158_vm1, %v3174_v26, 0  ;;  %v3855_v19 = vld [vmem:[%s4867_s2 + $0x64] sm:$0xf] }
 0x497   :  { %v3167_v49 = vsel %vm745_vm6, %v3162_v62, %v3164_v1  ;;  %v3172_v27 = vsel %vm745_vm6, %v3164_v1, 0  ;;  %3127 = vmatpush1.bf16.msra.mxu1 %v3066_v38  ;;  %3144 = vmatprep.mubr.bf16.mxu1 %v4925_v4  ;;  %v4960_v38 = vld [vmem:[#allocation16_spill] sm:$0xff] }
 0x498   :  { %v3177_v52 = vmul.bf16 %v3172_v27, %v4947_v15  ;;  %v3282_v30 = vpop.permute.xlu1 %3281  ;;  %3846 = vmatprep.subr.msk.bf16.mxu0 %vm158_vm1, %v3175_v41  ;;  %v3176_v11 = vmul.bf16 %v3167_v49, %v4948_v24  ;;  %v4959_v41 = vld [vmem:[#allocation17_spill] sm:$0xff]  ;;  %v3860_v15 = vld [vmem:[%s4867_s2 + $0x68] sm:$0xf] }
 0x49a   :  { %3842 = vmatmul.mubr.msk.bf16.vlgmr.msra.gmra.mxu0 %vm154_vm3, %v3840_v20  ;;  %3848 = vmatprep.subr.msk.bf16.mxu1 %vm158_vm1, %v3177_v52  ;;  %v3284_v32 = vpop.permute.xlu0 %3283  ;;  %v3190_v31 = vsel %vm158_vm1, %v3176_v11, 0 }
 0x49b   :  { %3210 = vmatpush1.bf16.msra.mxu0 %v3184_v58  ;;  %v3289_v36 = vsel %vm887_vm7, %v3282_v30, %v3284_v32  ;;  %3227 = vmatprep.mubr.bf16.mxu0 %v4925_v4 }
 0x49c   :  { %v3286_v2 = vpop.permute.xlu1 %3285  ;;  %v3298_v8 = vmul.bf16 %v3289_v36, %v4949_v29 }
 0x49d   :  { %v3290_v47 = vsel %vm887_vm7, %v3284_v32, %v3286_v2 }
 0x49e   :  { %v3299_v35 = vmul.bf16 %v3290_v47, %v4950_v25  ;;  %3844 = vmatmul.mubr.msk.bf16.vlgmr.msra.gmra.mxu1 %vm154_vm3, %v3840_v20  ;;  %v3288_v22 = vpop.permute.xlu0 %3287  ;;  %v3308_v61 = vsel %vm158_vm1, %v3298_v8, 0 }
 0x49f   :  { %3251 = vmatpush1.bf16.msra.mxu1 %v3190_v31  ;;  %v3291_v9 = vsel %vm887_vm7, %v3286_v2, %v3288_v22  ;;  %v3296_v44 = vsel %vm887_vm7, %v3288_v22, 0  ;;  %3268 = vmatprep.mubr.bf16.mxu1 %v4925_v4 }
 0x4a0   :  { %v3301_v55 = vmul.bf16 %v3296_v44, %v4951_v56  ;;  %v3406_v46 = vpop.permute.xlu1 %3405  ;;  %3851 = vmatprep.subr.msk.bf16.mxu0 %vm158_vm1, %v3299_v35  ;;  %v3300_v60 = vmul.bf16 %v3291_v9, %v4952_v28 }
 0x4a2   :  { %3847 = vmatmul.mubr.msk.bf16.vlgmr.msra.gmra.mxu0 %vm154_vm3, %v3845_v37  ;;  %3853 = vmatprep.subr.msk.bf16.mxu1 %vm158_vm1, %v3301_v55  ;;  %v3408_v57 = vpop.permute.xlu0 %3407  ;;  %v3314_v40 = vsel %vm158_vm1, %v3300_v60, 0 }
 0x4a3   :  { %3334 = vmatpush1.bf16.msra.mxu0 %v3308_v61  ;;  %v3413_v12 = vsel %vm1029_vm8, %v3406_v46, %v3408_v57  ;;  %3351 = vmatprep.mubr.bf16.mxu0 %v4925_v4 }
 0x4a4   :  { %v3410_v16 = vpop.permute.xlu1 %3409  ;;  %v3422_v14 = vmul.bf16 %v3413_v12, %v4953_v59 }
 0x4a5   :  { %v3414_v63 = vsel %vm1029_vm8, %v3408_v57, %v3410_v16 }
 0x4a6   :  { %v3423_v7 = vmul.bf16 %v3414_v63, %v4954_v54  ;;  %3849 = vmatmul.mubr.msk.bf16.vlgmr.msra.gmra.mxu1 %vm154_vm3, %v3845_v37  ;;  %v3412_v17 = vpop.permute.xlu0 %3411  ;;  %v3432_v34 = vsel %vm158_vm1, %v3422_v14, 0 }
 0x4a7   :  { %3375 = vmatpush1.bf16.msra.mxu1 %v3314_v40  ;;  %v3415_v5 = vsel %vm1029_vm8, %v3410_v16, %v3412_v17  ;;  %v3420_v6 = vsel %vm1029_vm8, %v3412_v17, 0  ;;  %3392 = vmatprep.mubr.bf16.mxu1 %v4925_v4 }
 0x4a8   :  { %v3425_v33 = vmul.bf16 %v3420_v6, %v4955_v45  ;;  %v3530_v18 = vpop.permute.xlu1 %3529  ;;  %3856 = vmatprep.subr.msk.bf16.mxu0 %vm158_vm1, %v3423_v7  ;;  %v3424_v23 = vmul.bf16 %v3415_v5, %v4956_v13 }
 0x4aa   :  { %3852 = vmatmul.mubr.msk.bf16.vlgmr.msra.gmra.mxu0 %vm154_vm3, %v3850_v3  ;;  %3858 = vmatprep.subr.msk.bf16.mxu1 %vm158_vm1, %v3425_v33  ;;  %v3532_v10 = vpop.permute.xlu0 %3531  ;;  %v3438_v42 = vsel %vm158_vm1, %v3424_v23, 0 }
 0x4ab   :  { %3458 = vmatpush1.bf16.msra.mxu0 %v3432_v34  ;;  %v3537_v43 = vsel %vm1171_vm9, %v3530_v18, %v3532_v10  ;;  %3475 = vmatprep.mubr.bf16.mxu0 %v4925_v4 }
 0x4ac   :  { %v3534_v0 = vpop.permute.xlu1 %3533  ;;  %v3546_v50 = vmul.bf16 %v3537_v43, %v4957_v53 }
 0x4ad   :  { %v3538_v39 = vsel %vm1171_vm9, %v3532_v10, %v3534_v0 }
 0x4ae   :  { %v3547_v21 = vmul.bf16 %v3538_v39, %v4958_v48  ;;  %3854 = vmatmul.mubr.msk.bf16.vlgmr.msra.gmra.mxu1 %vm154_vm3, %v3850_v3  ;;  %v3536_v62 = vpop.permute.xlu0 %3535  ;;  %v3556_v27 = vsel %vm158_vm1, %v3546_v50, 0 }
 0x4af   :  { %3499 = vmatpush1.bf16.msra.mxu1 %v3438_v42  ;;  %v3539_v51 = vsel %vm1171_vm9, %v3534_v0, %v3536_v62  ;;  %v3544_v26 = vsel %vm1171_vm9, %v3536_v62, 0  ;;  %3516 = vmatprep.mubr.bf16.mxu1 %v4925_v4 }
 0x4b0   :  { %v3549_v1 = vmul.bf16 %v3544_v26, %v4959_v41  ;;  %3861 = vmatprep.subr.msk.bf16.mxu0 %vm158_vm1, %v3547_v21  ;;  %v3548_v49 = vmul.bf16 %v3539_v51, %v4960_v38 }
 0x4b2   :  { %3857 = vmatmul.mubr.msk.bf16.vlgmr.msra.gmra.mxu0 %vm154_vm3, %v3855_v19  ;;  %3863 = vmatprep.subr.msk.bf16.mxu1 %vm158_vm1, %v3549_v1  ;;  %v3562_v20 = vsel %vm158_vm1, %v3548_v49, 0 }
 0x4b3   :  { %3582 = vmatpush1.bf16.msra.mxu0 %v3556_v27  ;;  %3599 = vmatprep.mubr.bf16.mxu0 %v4925_v4 }
 0x4b6   :  { %3859 = vmatmul.mubr.msk.bf16.vlgmr.msra.gmra.mxu1 %vm154_vm3, %v3855_v19 }
 0x4b7   :  { %3623 = vmatpush1.bf16.msra.mxu1 %v3562_v20  ;;  %3640 = vmatprep.mubr.bf16.mxu1 %v4925_v4 }
 0x4ba   :  { %3862 = vmatmul.mubr.msk.bf16.vlgmr.msra.gmra.mxu0 %vm154_vm3, %v3860_v15 }
 0x4be   :  { %3864 = vmatmul.mubr.msk.bf16.vlgmr.msra.gmra.mxu1 %vm154_vm3, %v3860_v15 }
 0x53a   :  { %v2661_v52 = vpop.f32.mrf.mxu0 }
 0x53c   :  { %v2663_v30 = vpop.f32.mrf.mxu0 }
 0x53e   :  { %v2665_v24 = vpop.f32.mrf.mxu0  ;;  %v2702_v11 = vpop.f32.mrf.mxu1 }
 0x540   :  { %v2666_v58 = vpop.f32.mrf.mxu0  ;;  %v2704_v32 = vpop.f32.mrf.mxu1 }
 0x542   :  { %v2706_v36 = vpop.f32.mrf.mxu1  ;;  %v2758_v2 = vpop.f32.mrf.mxu0 }
 0x543   :  { %v2759_v48 = vadd.f32 %v2758_v2, %v2661_v52 }
 0x544   :  { %v2707_v47 = vpop.f32.mrf.mxu1  ;;  %v2760_v29 = vpop.f32.mrf.mxu0 }
 0x545   :  { %v2761_v62 = vadd.f32 %v2760_v29, %v2663_v30 }
 0x546   :  { %v2762_v8 = vpop.f32.mrf.mxu0  ;;  %v2799_v25 = vpop.f32.mrf.mxu1 }
 0x547   :  { %v2800_v41 = vadd.f32 %v2799_v25, %v2702_v11 }
 0x548   :  { %v2763_v35 = vpop.f32.mrf.mxu0  ;;  %v2801_v31 = vpop.f32.mrf.mxu1 }
 0x549   :  { %v2802_v20 = vadd.f32 %v2801_v31, %v2704_v32 }
 0x54a   :  { %v2803_v22 = vpop.f32.mrf.mxu1  ;;  %v2878_v4 = vpop.f32.mrf.mxu0 }
 0x54b   :  { %v2926_v51 = vadd.f32 %v2878_v4, %v2759_v48 }
 0x54c   :  { %v2804_v9 = vpop.f32.mrf.mxu1  ;;  %v2880_v44 = vpop.f32.mrf.mxu0 }
 0x54d   :  { %v2927_v1 = vadd.f32 %v2880_v44, %v2761_v62 }
 0x54e   :  { %v2882_v37 = vpop.f32.mrf.mxu0  ;;  %v2919_v56 = vpop.f32.mrf.mxu1 }
 0x54f   :  { %v2928_v15 = vadd.f32 %v2919_v56, %v2800_v41  ;;  %v3658_v56 = vpop.permute.xlu1 %3657 }
 0x550   :  { %v2883_v55 = vpop.f32.mrf.mxu0  ;;  %v2921_v46 = vpop.f32.mrf.mxu1 }
 0x551   :  { %v2929_v8 = vadd.f32 %v2921_v46, %v2802_v20 }
 0x552   :  { %v2923_v28 = vpop.f32.mrf.mxu1  ;;  %v3002_v60 = vpop.f32.mrf.mxu0 }
 0x553   :  { %v3050_v38 = vadd.f32 %v3002_v60, %v2926_v51 }
 0x554   :  { %v2924_v61 = vpop.f32.mrf.mxu1  ;;  %v3004_v57 = vpop.f32.mrf.mxu0 }
 0x555   :  { %v3051_v24 = vadd.f32 %v3004_v57, %v2927_v1 }
 0x556   :  { %v3006_v12 = vpop.f32.mrf.mxu0  ;;  %v3043_v16 = vpop.f32.mrf.mxu1 }
 0x557   :  { %v3052_v35 = vadd.f32 %v3043_v16, %v2928_v15 }
 0x558   :  { %v3007_v63 = vpop.f32.mrf.mxu0  ;;  %v3045_v59 = vpop.f32.mrf.mxu1 }
 0x559   :  { %v3053_v29 = vadd.f32 %v3045_v59, %v2929_v8  ;;  %v4964_v8 = vld [vmem:[#allocation21_spill] sm:$0xff] }
 0x55a   :  { %v3047_v14 = vpop.f32.mrf.mxu1  ;;  %v3105_v54 = vpop.f32.mrf.mxu0 }
 0x55b   :  { %v3153_v58 = vadd.f32 %v3105_v54, %v3050_v38  ;;  %v4961_v38 = vld [vmem:[#allocation19_spill] sm:$0xff] }
 0x55c   :  { %v3048_v7 = vpop.f32.mrf.mxu1  ;;  %v3107_v40 = vpop.f32.mrf.mxu0 }
 0x55d   :  { %v3154_v52 = vadd.f32 %v3107_v40, %v3051_v24 }
 0x55e   :  { %v3109_v17 = vpop.f32.mrf.mxu0  ;;  %v3146_v5 = vpop.f32.mrf.mxu1 }
 0x55f   :  { %v3155_v4 = vadd.f32 %v3146_v5, %v3052_v35 }
 0x560   :  { %v3110_v6 = vpop.f32.mrf.mxu0  ;;  %v3148_v3 = vpop.f32.mrf.mxu1 }
 0x561   :  { %v3156_v37 = vadd.f32 %v3148_v3, %v3053_v29 }
 0x562   :  { %v3150_v45 = vpop.f32.mrf.mxu1  ;;  %v3229_v33 = vpop.f32.mrf.mxu0 }
 0x563   :  { %v3277_v2 = vadd.f32 %v3229_v33, %v3153_v58 }
 0x564   :  { %v3151_v18 = vpop.f32.mrf.mxu1  ;;  %v3231_v13 = vpop.f32.mrf.mxu0 }
 0x565   :  { %v3278_v9 = vadd.f32 %v3231_v13, %v3154_v52 }
 0x566   :  { %v3233_v23 = vpop.f32.mrf.mxu0  ;;  %v3270_v34 = vpop.f32.mrf.mxu1 }
 0x567   :  { %v3279_v55 = vadd.f32 %v3270_v34, %v3155_v4 }
 0x568   :  { %v3234_v10 = vpop.f32.mrf.mxu0  ;;  %v3272_v43 = vpop.f32.mrf.mxu1 }
 0x569   :  { %v3280_v61 = vadd.f32 %v3272_v43, %v3156_v37 }
 0x56a   :  { %v3274_v0 = vpop.f32.mrf.mxu1  ;;  %v3353_v39 = vpop.f32.mrf.mxu0 }
 0x56b   :  { %v3401_v11 = vadd.f32 %v3353_v39, %v3277_v2 }
 0x56c   :  { %v3275_v53 = vpop.f32.mrf.mxu1  ;;  %v3355_v50 = vpop.f32.mrf.mxu0 }
 0x56d   :  { %v3402_v32 = vadd.f32 %v3355_v50, %v3278_v9 }
 0x56e   :  { %v3357_v21 = vpop.f32.mrf.mxu0  ;;  %v3394_v42 = vpop.f32.mrf.mxu1 }
 0x56f   :  { %v3403_v46 = vadd.f32 %v3394_v42, %v3279_v55 }
 0x570   :  { %v3358_v26 = vpop.f32.mrf.mxu0  ;;  %v3396_v19 = vpop.f32.mrf.mxu1 }
 0x571   :  { %v3404_v14 = vadd.f32 %v3396_v19, %v3280_v61 }
 0x572   :  { %v3398_v49 = vpop.f32.mrf.mxu1  ;;  %v3477_v27 = vpop.f32.mrf.mxu0 }
 0x573   :  { %v3525_v31 = vadd.f32 %v3477_v27, %v3401_v11  ;;  %v4962_v27 = vld [vmem:[#allocation20_spill] sm:$0xff] }
 0x574   :  { %v3399_v36 = vpop.f32.mrf.mxu1  ;;  %v3479_v47 = vpop.f32.mrf.mxu0 }
 0x575   :  { %v3526_v57 = vadd.f32 %v3479_v47, %v3402_v32  ;;  %v4963_v36 = vld [vmem:[#allocation18_spill] sm:$0xff] }
 0x576   :  { %v3481_v22 = vpop.f32.mrf.mxu0  ;;  %v3518_v30 = vpop.f32.mrf.mxu1 }
 0x577   :  { %v3527_v59 = vadd.f32 %v3518_v30, %v3403_v46 }
 0x578   :  { %v3482_v25 = vpop.f32.mrf.mxu0  ;;  %v3520_v44 = vpop.f32.mrf.mxu1 }
 0x579   :  { %v3528_v5 = vadd.f32 %v3520_v44, %v3404_v14 }
 0x57a   :  { %v3522_v28 = vpop.f32.mrf.mxu1  ;;  %v3601_v60 = vpop.f32.mrf.mxu0 }
 0x57b   :  { %v3649_v12 = vadd.f32 %v3601_v60, %v3525_v31 }
 0x57c   :  { %v3523_v16 = vpop.f32.mrf.mxu1  ;;  %v3603_v63 = vpop.f32.mrf.mxu0 }
 0x57d   :  { %v3660_v54 = vadd.f32 %v3658_v56, %v3649_v12  ;;  %v3650_v7 = vadd.f32 %v3603_v63, %v3526_v57 }
 0x57e   :  { %v3642_v40 = vpop.f32.mrf.mxu1  ;;  %v3605_v17 = vpop.f32.mrf.mxu0 }
 0x57f   :  { %v3866_v6 = vmul.f32 -1.442695, %v3660_v54  ;;  %v3661_v3 = vadd.f32 %v3658_v56, %v3650_v7  ;;  %v3651_v45 = vadd.f32 %v3642_v40, %v3527_v59 }
 0x580   :  { %v3644_v33 = vpop.f32.mrf.mxu1  ;;  %v3606_v18 = vpop.f32.mrf.mxu0 }
 0x581   :  { %3909 = vpow2.f32 %v3866_v6  ;;  %v3867_v13 = vmul.f32 -1.442695, %v3661_v3  ;;  %v3662_v23 = vadd.f32 %v3658_v56, %v3651_v45  ;;  %v3652_v34 = vadd.f32 %v3644_v33, %v3528_v5 }
 0x582   :  { %v3646_v10 = vpop.f32.mrf.mxu1 }
 0x583   :  { %3911 = vpow2.f32 %v3867_v13  ;;  %v3868_v43 = vmul.f32 -1.442695, %v3662_v23  ;;  %v3663_v0 = vadd.f32 %v3658_v56, %v3652_v34 }
 0x584   :  { %v3647_v39 = vpop.f32.mrf.mxu1 }
 0x585   :  { %3913 = vpow2.f32 %v3868_v43  ;;  %v3869_v53 = vmul.f32 -1.442695, %v3663_v0 }
 0x587   :  { %3915 = vpow2.f32 %v3869_v53 }
 0x58e   :  { %v3910_v50 = vpop.eup %3909 }
 0x58f   :  { %v3676_v48 = vadd.f32 1.0, %v3910_v50 }
 0x590   :  { %v3912_v21 = vpop.eup %3911 }
 0x591   :  { %3917 = vrcp.f32 %v3676_v48  ;;  %v3677_v42 = vadd.f32 1.0, %v3912_v21 }
 0x592   :  { %v3914_v62 = vpop.eup %3913 }
 0x593   :  { %3919 = vrcp.f32 %v3677_v42  ;;  %v3678_v51 = vadd.f32 1.0, %v3914_v62 }
 0x594   :  { %v3916_v26 = vpop.eup %3915 }
 0x595   :  { %3921 = vrcp.f32 %v3678_v51  ;;  %v3679_v19 = vadd.f32 1.0, %v3916_v26 }
 0x597   :  { %3923 = vrcp.f32 %v3679_v19 }
 0x59e   :  { %v3918_v41 = vpop.eup %3917 }
 0x59f   :  { %v3688_v49 = vmul.f32 %v3918_v41, %v4961_v38 }
 0x5a0   :  { %v3920_v1 = vpop.eup %3919 }
 0x5a1   :  { %v3689_v20 = vmul.f32 %v3920_v1, %v4962_v27 }
 0x5a2   :  { %v3922_v15 = vpop.eup %3921 }
 0x5a3   :  { %v3872_v24 = vpack.c.bf16 %v3689_v20, %v3688_v49  ;;  %v3690_v47 = vmul.f32 %v3922_v15, %v4963_v36 }
 0x5a4   :  { %v3924_v58 = vpop.eup %3923 }
 0x5a5   :  { %3708 = vst [vmem:[%s4870_s5] sm:$0xff] %v3872_v24  ;;  %v3691_v35 = vmul.f32 %v3924_v58, %v4964_v8 }
 0x5a7   :  { %v3873_v52 = vpack.c.bf16 %v3691_v35, %v3690_v47 }
 0x5a9   :  { %3709 = vst [vmem:[%s4870_s5 + $0x8] sm:$0xff] %v3873_v52 }

</bundles_post_ra>
